<compile_context>
chip_gen: v7x
topology: tpu7x:2x2x1
jax: 0.10.0
libtpu: 0.0.40
codegen_flags: <defaults>
</compile_context>

<pallas_src>
import functools
from collections import namedtuple

import jax
import jax.numpy as jnp
from jax.experimental import pallas as pl
from jax.experimental.pallas import tpu as pltpu

LEAKY_SLOPE = 0.01
BN_EPS = 1e-5
_MAX_TILE_M = 2048          # lane tile of the flattened spatial axis (v7x-safe)

_Geom = namedtuple("_Geom", ["k", "stride", "hp", "wp", "ho1", "wo1",
                             "tile_m", "m_pad", "halo_pad", "win_len", "l_in"])


def _round_up(x, m):
    return (x + m - 1) // m * m


def _vmem_limit(block_bytes):
    # Per-generation scoped-VMEM budget (128 MiB on v5e/v6e, 64 MiB on v7x).
    try:
        cap = int(pltpu.get_tpu_info().vmem_capacity_bytes)
    except Exception:                                   # conservative fallback
        cap = 64 * 2 ** 20
    return int(min(3 * cap // 4, max(32 * 2 ** 20, 4 * int(block_bytes))))


def _make_geom(h_in, w_in, k, stride):
    """Flat planar-slab geometry for one reflect-pad + conv layer."""
    p = k // 2
    hp, wp = h_in + 2 * p, w_in + 2 * p
    ho1, wo1 = hp - k + 1, wp - k + 1           # stride-1 (dense) output extent
    m_needed = ho1 * wp
    if m_needed <= _MAX_TILE_M:
        tile_m = _round_up(m_needed, 128)
        m_pad = tile_m
    else:
        tile_m = _MAX_TILE_M
        m_pad = _round_up(m_needed, tile_m)
    max_off = (k - 1) * wp + (k - 1)
    halo_pad = _round_up(max_off, 128) if max_off else 0
    win_len = tile_m + halo_pad
    l_in = max(m_pad + halo_pad, _round_up(hp * wp, 128))
    return _Geom(k, stride, hp, wp, ho1, wo1, tile_m, m_pad, halo_pad,
                 win_len, l_in)


# ----------------------------------------------------------------------------
# Layout helpers (host-side XLA).
# TODO(synk): have each conv write its output directly in the next layer's
# padded flat layout (interior is a constant lane shift when kernel sizes
# match; borders via a tiny fixup) to remove these remaining repack passes.
# ----------------------------------------------------------------------------
def _pad_to_slab(img, g, dtype):
    """NCHW image -> reflection-padded flat planar slab (N, C, l_in)."""
    n, c = img.shape[0], img.shape[1]
    p = g.k // 2
    xp = (jnp.pad(img, ((0, 0), (0, 0), (p, p), (p, p)), mode="reflect")
          if p else img)
    flat = xp.reshape(n, c, g.hp * g.wp)
    flat = jnp.pad(flat, ((0, 0), (0, 0), (0, g.l_in - g.hp * g.wp)))
    return flat.astype(dtype)


def _extract_image(y_flat, g):
    """Flat conv-output slab -> valid NCHW image (applies stride)."""
    n, c = y_flat.shape[0], y_flat.shape[1]
    img = y_flat[:, :, :g.ho1 * g.wp].reshape(n, c, g.ho1, g.wp)[:, :, :, :g.wo1]
    if g.stride > 1:
        # TODO(synk): compute only strided outputs inside the kernel instead of
        # the dense stride-1 result + this wrapper subsample.
        img = img[:, :, ::g.stride, ::g.stride]
    return img


def _w2d(w):
    """(Cout, Cin, k, k) -> lane-dense (Cout, k*k*Cin), row r=(di*k+dj)*Cin+ci."""
    co, ci, k, _ = w.shape
    return jnp.transpose(w, (0, 2, 3, 1)).reshape(co, k * k * ci)


# ----------------------------------------------------------------------------
# Fused conv kernel: [BN-affine + residual + ReLU prologue] -> reflect-padded
# conv (single stacked-tap MXU matmul) -> bias + leaky_relu -> [BN stats].
# ----------------------------------------------------------------------------
def _make_conv_kernel(*, cin, taps_off, tile_m, win_len, mode, want_stats,
                      compute_dtype):
    def kernel(*refs):
        it = iter(refs)
        x_ref, w_ref, b_ref = next(it), next(it), next(it)
        if mode != "plain":
            scale_ref, shift_ref = next(it), next(it)
        if mode == "bn_res_relu":
            res_ref = next(it)
        if want_stats:
            mask_ref = next(it)
        o_ref = next(it)
        if want_stats:
            sum_ref, ssq_ref = next(it), next(it)
        stack_ref = next(it)

        j = pl.program_id(1)
        start = pl.multiple_of(j * tile_m, 128)

        # One aligned window load + fused prologue of the *previous* layer's
        # BatchNorm affine / residual add / ReLU (they commute with reflection
        # padding), all in f32.
        win = x_ref[0, :, pl.ds(start, win_len)].astype(jnp.float32)
        if mode != "plain":
            win = win * scale_ref[...] + shift_ref[...]
            if mode == "bn_res_relu":
                win = win + res_ref[0, :, pl.ds(start, win_len)].astype(jnp.float32)
            win = jnp.maximum(win, jnp.float32(0.0))

        # Stacked-tap operand in VMEM scratch: every tap is an in-register lane
        # shift of the single loaded window (no per-tap HBM/VMEM reloads).
        for t, off in enumerate(taps_off):
            stack_ref[t * cin:(t + 1) * cin, :] = (
                win[:, off:off + tile_m].astype(compute_dtype))

        # One MXU contraction over K = k*k*Cin (instead of k*k tiny matmuls).
        acc = jnp.dot(w_ref[...], stack_ref[...],
                      preferred_element_type=jnp.float32)       # (Cout, tile_m)
        acc = acc + b_ref[...]
        acc = jnp.where(acc >= 0, acc, jnp.float32(LEAKY_SLOPE) * acc)
        o_ref[0] = acc.astype(o_ref.dtype)

        if want_stats:
            # Fused BatchNorm statistics over valid lanes; the masked
            # cross-lane reductions run as two tiny MXU column dots.
            mcol = mask_ref[...]                                # (tile_m, 1)
            s = jnp.dot(acc, mcol, preferred_element_type=jnp.float32)
            q = jnp.dot(acc * acc, mcol, preferred_element_type=jnp.float32)

            @pl.when(j == 0)
            def _init():
                sum_ref[0] = s
                ssq_ref[0] = q

            @pl.when(j != 0)
            def _accum():
                sum_ref[0] = sum_ref[0] + s
                ssq_ref[0] = ssq_ref[0] + q

    return kernel


def conv_block(x_slab, w2d, bias, g, *, mode="plain", scale=None, shift=None,
               res_slab=None, want_stats=False, compute_dtype, out_dtype):
    """One ConvLayer (reflect pad + conv + leaky_relu) with optional fused
    input prologue (mode: 'plain' | 'bn_relu' | 'bn_res_relu') and optional
    fused BatchNorm statistics."""
    n, cin, l_in = x_slab.shape
    assert l_in == g.l_in
    cout, kdim = w2d.shape
    kk = g.k * g.k
    assert kdim == kk * cin
    taps_off = tuple(di * g.wp + dj for di in range(g.k) for dj in range(g.k))
    grid = (n, g.m_pad // g.tile_m)

    in_specs = [
        pl.BlockSpec((1, cin, g.l_in), lambda i, j: (i, 0, 0)),
        pl.BlockSpec((cout, kdim), lambda i, j: (0, 0)),        # resident
        pl.BlockSpec((cout, 1), lambda i, j: (0, 0)),           # resident
    ]
    inputs = [x_slab, w2d.astype(compute_dtype),
              bias.reshape(cout, 1).astype(jnp.float32)]
    if mode != "plain":
        assert scale is not None and shift is not None
        in_specs += [pl.BlockSpec((cin, 1), lambda i, j: (0, 0))] * 2
        inputs += [scale.reshape(cin, 1).astype(jnp.float32),
                   shift.reshape(cin, 1).astype(jnp.float32)]
    if mode == "bn_res_relu":
        assert res_slab is not None and res_slab.shape == x_slab.shape
        in_specs.append(pl.BlockSpec((1, cin, g.l_in), lambda i, j: (i, 0, 0)))
        inputs.append(res_slab)
    if want_stats:
        idx = jnp.arange(g.m_pad, dtype=jnp.int32)
        mask = (idx < g.ho1 * g.wp) & ((idx % g.wp) < g.wo1)
        in_specs.append(pl.BlockSpec((g.tile_m, 1), lambda i, j: (j, 0)))
        inputs.append(mask.astype(jnp.float32).reshape(g.m_pad, 1))

    if want_stats:
        out_specs = (pl.BlockSpec((1, cout, g.tile_m), lambda i, j: (i, 0, j)),
                     pl.BlockSpec((1, cout, 1), lambda i, j: (i, 0, 0)),
                     pl.BlockSpec((1, cout, 1), lambda i, j: (i, 0, 0)))
        out_shape = (jax.ShapeDtypeStruct((n, cout, g.m_pad), out_dtype),
                     jax.ShapeDtypeStruct((n, cout, 1), jnp.float32),
                     jax.ShapeDtypeStruct((n, cout, 1), jnp.float32))
    else:
        out_specs = pl.BlockSpec((1, cout, g.tile_m), lambda i, j: (i, 0, j))
        out_shape = jax.ShapeDtypeStruct((n, cout, g.m_pad), out_dtype)

    kernel = _make_conv_kernel(cin=cin, taps_off=taps_off, tile_m=g.tile_m,
                               win_len=g.win_len, mode=mode,
                               want_stats=want_stats,
                               compute_dtype=compute_dtype)

    isz = jnp.dtype(compute_dtype).itemsize
    osz = jnp.dtype(out_dtype).itemsize
    n_in_slabs = 2 if mode == "bn_res_relu" else 1
    block_bytes = (2 * n_in_slabs * cin * g.l_in * isz       # x (+res), dbl buf
                   + cout * kdim * isz + cout * 4
                   + 2 * cout * g.tile_m * osz               # output, dbl buf
                   + kk * cin * g.tile_m * isz               # stacked operand
                   + 2 * cin * g.win_len * 4                 # in-flight window
                   + g.tile_m * 4 + 8 * cout * 4)
    flops = 2 * n * kk * cin * cout * g.m_pad + (
        4 * n * cout * g.m_pad if want_stats else 0)
    bytes_acc = n * (n_in_slabs * cin * g.l_in * isz + cout * g.m_pad * osz)

    outs = pl.pallas_call(
        kernel,
        grid=grid,
        in_specs=in_specs,
        out_specs=out_specs,
        out_shape=out_shape,
        scratch_shapes=[pltpu.VMEM((kk * cin, g.tile_m), compute_dtype)],
        compiler_params=pltpu.CompilerParams(
            dimension_semantics=("parallel", "arbitrary"),
            vmem_limit_bytes=_vmem_limit(block_bytes)),
        cost_estimate=pl.CostEstimate(flops=flops, transcendentals=0,
                                      bytes_accessed=bytes_acc),
    )(*inputs)
    # TODO(synk): for very large images, halo-tile the *input* slab with manual
    # make_async_copy DMAs instead of keeping the whole padded row-slab of one
    # image resident per grid-i step.

    if want_stats:
        y, sums, ssqs = outs
        return y, sums[:, :, 0], ssqs[:, :, 0]
    return outs


# ----------------------------------------------------------------------------
# BatchNorm batch statistics -> per-channel affine (applied in the next conv).
# ----------------------------------------------------------------------------
def _bn_affine(sums, ssqs, count, gamma, beta):
    # Training-mode biased variance, E[x^2]-mean^2 in f32 (fine at these
    # magnitudes; use a two-pass/Welford update if activations can be large).
    mean = jnp.sum(sums, axis=0) / count
    var = jnp.maximum(jnp.sum(ssqs, axis=0) / count - mean * mean, 0.0)
    scale = gamma.astype(jnp.float32) * jax.lax.rsqrt(var + jnp.float32(BN_EPS))
    shift = beta.astype(jnp.float32) - mean * scale
    return scale, shift


# ----------------------------------------------------------------------------
# Encoder forward: 4 pallas_calls (one per conv), BN/ReLU/residual fused in.
# TODO(synk): for small whole-batch working sets, fuse the entire encoder into
# a single pallas_call keeping all intermediates in VMEM scratch.
# ----------------------------------------------------------------------------
def encoder_forward(x_nchw, params, *, kernel_size, stride,
                    compute_dtype=jnp.bfloat16):
    x = x_nchw.astype(jnp.float32)
    n, _, h, w = x.shape
    act_dtype = compute_dtype          # bf16 inter-layer activations (perf path)

    # Encoder.conv1: reflect pad + conv + leaky_relu (no BN -> no stats).
    g1 = _make_geom(h, w, kernel_size, stride)
    y1 = conv_block(_pad_to_slab(x, g1, compute_dtype),
                    _w2d(params["w1"]), params["b1"], g1,
                    compute_dtype=compute_dtype, out_dtype=act_dtype)
    h1 = _extract_image(y1, g1)                           # residual source
    h1h, h1w = int(h1.shape[2]), int(h1.shape[3])

    # ResidualBlock.conv1 (+ leaky) with fused BN statistics.
    gr = _make_geom(h1h, h1w, 3, 1)
    x1 = _pad_to_slab(h1, gr, compute_dtype)
    y2, s2, q2 = conv_block(x1, _w2d(params["rw1"]), params["rb1"], gr,
                            want_stats=True,
                            compute_dtype=compute_dtype, out_dtype=act_dtype)
    count = n * gr.ho1 * gr.wo1
    sc1, sh1 = _bn_affine(s2, q2, count, params["g1"], params["be1"])

    # ResidualBlock.conv2: bn1 + ReLU fused into this conv's input prologue.
    x2 = _pad_to_slab(_extract_image(y2, gr), gr, compute_dtype)
    y3, s3, q3 = conv_block(x2, _w2d(params["rw2"]), params["rb2"], gr,
                            mode="bn_relu", scale=sc1, shift=sh1,
                            want_stats=True,
                            compute_dtype=compute_dtype, out_dtype=act_dtype)
    sc2, sh2 = _bn_affine(s3, q3, count, params["g2"], params["be2"])

    # Encoder.conv2: bn2 + residual(h1) + ReLU fused into its input prologue.
    g2 = _make_geom(h1h, h1w, kernel_size, stride)
    x3 = _pad_to_slab(_extract_image(y3, gr), g2, compute_dtype)
    # When the geometries match (kernel_size == 3) the padded residual slab is
    # exactly the already-built x1 -> no extra embed/repack pass.
    res_slab = x1 if kernel_size == 3 else _pad_to_slab(h1, g2, compute_dtype)
    y4 = conv_block(x3, _w2d(params["w2"]), params["b2"], g2,
                    mode="bn_res_relu", scale=sc2, shift=sh2, res_slab=res_slab,
                    compute_dtype=compute_dtype, out_dtype=jnp.float32)
    return _extract_image(y4, g2).astype(jnp.float32)     # NCHW


# ----------------------------------------------------------------------------
# Pure-JAX reference (silent correctness check).
# ----------------------------------------------------------------------------
def _ref_conv_layer(x, w, b, stride):
    k = w.shape[2]
    p = k // 2
    xp = (jnp.pad(x, ((0, 0), (0, 0), (p, p), (p, p)), mode="reflect")
          if p else x)
    y = jax.lax.conv_general_dilated(
        xp, w, (stride, stride), "VALID",
        dimension_numbers=("NCHW", "OIHW", "NCHW"),
        precision=jax.lax.Precision.HIGHEST)
    y = y + b.reshape(1, -1, 1, 1)
    return jnp.where(y >= 0, y, LEAKY_SLOPE * y)


def _ref_bn(x, g, b):
    mean = jnp.mean(x, axis=(0, 2, 3), keepdims=True)
    var = jnp.mean((x - mean) ** 2, axis=(0, 2, 3), keepdims=True)
    y = (x - mean) * jax.lax.rsqrt(var + BN_EPS)
    return y * g.reshape(1, -1, 1, 1) + b.reshape(1, -1, 1, 1)


def encoder_reference(x, params, *, kernel_size, stride):
    h1 = _ref_conv_layer(x, params["w1"], params["b1"], stride)
    r = _ref_conv_layer(h1, params["rw1"], params["rb1"], 1)
    r = jnp.maximum(_ref_bn(r, params["g1"], params["be1"]), 0.0)
    r = _ref_conv_layer(r, params["rw2"], params["rb2"], 1)
    r = jnp.maximum(_ref_bn(r, params["g2"], params["be2"]) + h1, 0.0)
    return _ref_conv_layer(r, params["w2"], params["b2"], stride)


# ----------------------------------------------------------------------------
# Deterministic parameter init + demo
# ----------------------------------------------------------------------------
def init_params(key, in_channels, out_channels, kernel_size):
    ks = jax.random.split(key, 12)

    def w(k_, ksz, ci):
        return 0.1 * jax.random.normal(k_, (out_channels, ci, ksz, ksz),
                                       jnp.float32)

    def b(k_):
        return 0.01 * jax.random.normal(k_, (out_channels,), jnp.float32)

    return {
        "w1": w(ks[0], kernel_size, in_channels), "b1": b(ks[1]),
        "rw1": w(ks[2], 3, out_channels), "rb1": b(ks[3]),
        "g1": 1.0 + 0.1 * jax.random.normal(ks[4], (out_channels,), jnp.float32),
        "be1": 0.1 * jax.random.normal(ks[5], (out_channels,), jnp.float32),
        "rw2": w(ks[6], 3, out_channels), "rb2": b(ks[7]),
        "g2": 1.0 + 0.1 * jax.random.normal(ks[8], (out_channels,), jnp.float32),
        "be2": 0.1 * jax.random.normal(ks[9], (out_channels,), jnp.float32),
        "w2": w(ks[10], kernel_size, out_channels), "b2": b(ks[11]),
    }


if __name__ == "__main__":
    in_channels, out_channels = 4, 8
    kernel_size, stride = 3, 1
    batch, H, W = 2, 16, 16

    key = jax.random.PRNGKey(0)
    kx, kp = jax.random.split(key)
    x = jax.random.normal(kx, (batch, in_channels, H, W), dtype=jnp.float32)
    params = init_params(kp, in_channels, out_channels, kernel_size)

    ref = jax.block_until_ready(
        encoder_reference(x, params, kernel_size=kernel_size, stride=stride))

    # f32 path: tight parity with the PyTorch module numerics.
    fwd_f32 = jax.jit(functools.partial(encoder_forward,
                                        kernel_size=kernel_size, stride=stride,
                                        compute_dtype=jnp.float32))
    out_f32 = jax.block_until_ready(fwd_f32(x, params))
    assert out_f32.shape == (batch, out_channels, H, W), out_f32.shape
    err = float(jnp.max(jnp.abs(out_f32 - ref)))
    assert err < 5e-4, err

    # bf16 default perf path: bf16 MXU operands + bf16 inter-layer slabs,
    # f32 accumulation / BN statistics.
    fwd_bf16 = jax.jit(functools.partial(encoder_forward,
                                         kernel_size=kernel_size,
                                         stride=stride))
    out_bf16 = jax.block_until_ready(fwd_bf16(x, params))
    err_bf16 = float(jnp.max(jnp.abs(out_bf16 - ref)))
    assert out_bf16.shape == out_f32.shape and err_bf16 < 0.3, err_bf16

    print("KERNEL_OK")
</pallas_src>

<mosaic_0001>
module attributes {stable_mosaic.version = 11 : i64} {
  func.func @kernel(%arg0: i32, %arg1: i32, %arg2: memref<1x4x512xf32, #tpu.memory_space<vmem>>, %arg3: memref<8x36xf32, #tpu.memory_space<vmem>>, %arg4: memref<8x1xf32, #tpu.memory_space<vmem>>, %arg5: memref<1x8x384xf32, #tpu.memory_space<vmem>>, %arg6: memref<36x384xf32, #tpu.memory_space<vmem>>) attributes {dimension_semantics = [#tpu.dimension_semantics<parallel>, #tpu.dimension_semantics<arbitrary>], iteration_bounds = array<i64: 2, 1>, scalar_prefetch = 0 : i64, scratch_operands = 1 : i64, tpu.core_type = #tpu.core_type<tc>, window_params = [{transform_indices = @transform_0, window_bounds = array<i64: 1, 4, 512>}, {pipeline_mode = #tpu.pipeline_mode<synchronous>, transform_indices = @transform_1, window_bounds = array<i64: 8, 36>}, {pipeline_mode = #tpu.pipeline_mode<synchronous>, transform_indices = @transform_2, window_bounds = array<i64: 8, 1>}, {transform_indices = @transform_3, window_bounds = array<i64: 1, 8, 384>}]} {
    %c384_i32 = arith.constant 384 : i32
    %0 = arith.muli %arg1, %c384_i32 : i32
    %1 = tpu.assume_multiple %0, 128 : i32
    %c0 = arith.constant 0 : index
    %c0_0 = arith.constant 0 : index
    %2 = arith.index_cast %1 : i32 to index
    %3 = vector.load %arg2[%c0, %c0_0, %2] : memref<1x4x512xf32, #tpu.memory_space<vmem>>, vector<1x4x512xf32>
    %4 = vector.shape_cast %3 : vector<1x4x512xf32> to vector<4x512xf32>
    %5 = vector.extract_strided_slice %4 {offsets = [0, 0], sizes = [4, 384], strides = [1, 1]} : vector<4x512xf32> to vector<4x384xf32>
    %c0_1 = arith.constant 0 : index
    %c0_2 = arith.constant 0 : index
    %6 = vector.load %arg6[%c0_1, %c0_2] : memref<36x384xf32, #tpu.memory_space<vmem>>, vector<4x384xf32>
    tpu.vector_store %arg6[%c0_1, %c0_2], %5 {strides = array<i32>} : memref<36x384xf32, #tpu.memory_space<vmem>>, vector<4x384xf32>,
    %7 = vector.extract_strided_slice %4 {offsets = [0, 1], sizes = [4, 384], strides = [1, 1]} : vector<4x512xf32> to vector<4x384xf32>
    %c4 = arith.constant 4 : index
    %c0_3 = arith.constant 0 : index
    %8 = vector.load %arg6[%c4, %c0_3] : memref<36x384xf32, #tpu.memory_space<vmem>>, vector<4x384xf32>
    tpu.vector_store %arg6[%c4, %c0_3], %7 {strides = array<i32>} : memref<36x384xf32, #tpu.memory_space<vmem>>, vector<4x384xf32>,
    %9 = vector.extract_strided_slice %4 {offsets = [0, 2], sizes = [4, 384], strides = [1, 1]} : vector<4x512xf32> to vector<4x384xf32>
    %c8 = arith.constant 8 : index
    %c0_4 = arith.constant 0 : index
    %10 = vector.load %arg6[%c8, %c0_4] : memref<36x384xf32, #tpu.memory_space<vmem>>, vector<4x384xf32>
    tpu.vector_store %arg6[%c8, %c0_4], %9 {strides = array<i32>} : memref<36x384xf32, #tpu.memory_space<vmem>>, vector<4x384xf32>,
    %11 = vector.extract_strided_slice %4 {offsets = [0, 18], sizes = [4, 384], strides = [1, 1]} : vector<4x512xf32> to vector<4x384xf32>
    %c12 = arith.constant 12 : index
    %c0_5 = arith.constant 0 : index
    %12 = vector.load %arg6[%c12, %c0_5] : memref<36x384xf32, #tpu.memory_space<vmem>>, vector<4x384xf32>
    tpu.vector_store %arg6[%c12, %c0_5], %11 {strides = array<i32>} : memref<36x384xf32, #tpu.memory_space<vmem>>, vector<4x384xf32>,
    %13 = vector.extract_strided_slice %4 {offsets = [0, 19], sizes = [4, 384], strides = [1, 1]} : vector<4x512xf32> to vector<4x384xf32>
    %c16 = arith.constant 16 : index
    %c0_6 = arith.constant 0 : index
    %14 = vector.load %arg6[%c16, %c0_6] : memref<36x384xf32, #tpu.memory_space<vmem>>, vector<4x384xf32>
    tpu.vector_store %arg6[%c16, %c0_6], %13 {strides = array<i32>} : memref<36x384xf32, #tpu.memory_space<vmem>>, vector<4x384xf32>,
    %15 = vector.extract_strided_slice %4 {offsets = [0, 20], sizes = [4, 384], strides = [1, 1]} : vector<4x512xf32> to vector<4x384xf32>
    %c20 = arith.constant 20 : index
    %c0_7 = arith.constant 0 : index
    %16 = vector.load %arg6[%c20, %c0_7] : memref<36x384xf32, #tpu.memory_space<vmem>>, vector<4x384xf32>
    tpu.vector_store %arg6[%c20, %c0_7], %15 {strides = array<i32>} : memref<36x384xf32, #tpu.memory_space<vmem>>, vector<4x384xf32>,
    %17 = vector.extract_strided_slice %4 {offsets = [0, 36], sizes = [4, 384], strides = [1, 1]} : vector<4x512xf32> to vector<4x384xf32>
    %c24 = arith.constant 24 : index
    %c0_8 = arith.constant 0 : index
    %18 = vector.load %arg6[%c24, %c0_8] : memref<36x384xf32, #tpu.memory_space<vmem>>, vector<4x384xf32>
    tpu.vector_store %arg6[%c24, %c0_8], %17 {strides = array<i32>} : memref<36x384xf32, #tpu.memory_space<vmem>>, vector<4x384xf32>,
    %19 = vector.extract_strided_slice %4 {offsets = [0, 37], sizes = [4, 384], strides = [1, 1]} : vector<4x512xf32> to vector<4x384xf32>
    %c28 = arith.constant 28 : index
    %c0_9 = arith.constant 0 : index
    %20 = vector.load %arg6[%c28, %c0_9] : memref<36x384xf32, #tpu.memory_space<vmem>>, vector<4x384xf32>
    tpu.vector_store %arg6[%c28, %c0_9], %19 {strides = array<i32>} : memref<36x384xf32, #tpu.memory_space<vmem>>, vector<4x384xf32>,
    %21 = vector.extract_strided_slice %4 {offsets = [0, 38], sizes = [4, 384], strides = [1, 1]} : vector<4x512xf32> to vector<4x384xf32>
    %c32 = arith.constant 32 : index
    %c0_10 = arith.constant 0 : index
    %22 = vector.load %arg6[%c32, %c0_10] : memref<36x384xf32, #tpu.memory_space<vmem>>, vector<4x384xf32>
    tpu.vector_store %arg6[%c32, %c0_10], %21 {strides = array<i32>} : memref<36x384xf32, #tpu.memory_space<vmem>>, vector<4x384xf32>,
    %c0_11 = arith.constant 0 : index
    %c0_12 = arith.constant 0 : index
    %23 = vector.load %arg3[%c0_11, %c0_12] : memref<8x36xf32, #tpu.memory_space<vmem>>, vector<8x36xf32>
    %c0_13 = arith.constant 0 : index
    %c0_14 = arith.constant 0 : index
    %24 = vector.load %arg6[%c0_13, %c0_14] : memref<36x384xf32, #tpu.memory_space<vmem>>, vector<36x384xf32>
    %cst = arith.constant dense<0.000000e+00> : vector<8x384xf32>
    %25 = tpu.matmul %23, %24, %cst {dimension_numbers = #tpu.dot_dimension_numbers<[1], [0], [0], [1], [0, 0, 1, 1], [], []>} : vector<8x36xf32>, vector<36x384xf32>, vector<8x384xf32> -> vector<8x384xf32>
    %c0_15 = arith.constant 0 : index
    %c0_16 = arith.constant 0 : index
    %26 = vector.load %arg4[%c0_15, %c0_16] : memref<8x1xf32, #tpu.memory_space<vmem>>, vector<8x1xf32>
    %27 = vector.broadcast %26 : vector<8x1xf32> to vector<8x384xf32>
    %28 = arith.addf %25, %27 : vector<8x384xf32>
    %cst_17 = arith.constant 0.000000e+00 : f32
    %29 = vector.broadcast %cst_17 : f32 to vector<8x384xf32>
    %30 = arith.cmpf oge, %28, %29 : vector<8x384xf32>
    %cst_18 = arith.constant 0.00999999977 : f32
    %31 = vector.broadcast %cst_18 : f32 to vector<8x384xf32>
    %32 = arith.mulf %31, %28 : vector<8x384xf32>
    %33 = arith.select %30, %28, %32 : vector<8x384xi1>, vector<8x384xf32>
    %c0_19 = arith.constant 0 : index
    %c0_20 = arith.constant 0 : index
    %c0_21 = arith.constant 0 : index
    %34 = vector.load %arg5[%c0_19, %c0_20, %c0_21] : memref<1x8x384xf32, #tpu.memory_space<vmem>>, vector<1x8x384xf32>
    %35 = vector.shape_cast %34 : vector<1x8x384xf32> to vector<8x384xf32>
    %36 = vector.shape_cast %33 : vector<8x384xf32> to vector<1x8x384xf32>
    tpu.vector_store %arg5[%c0_19, %c0_20, %c0_21], %36 {strides = array<i32>} : memref<1x8x384xf32, #tpu.memory_space<vmem>>, vector<1x8x384xf32>,
    return
  }
  func.func @transform_0(%arg0: i32, %arg1: i32) -> (i32, i32, i32) {
    %c0_i32 = arith.constant 0 : i32
    %c0_i32_0 = arith.constant 0 : i32
    %c0_i32_1 = arith.constant 0 : i32
    return %arg0, %c0_i32, %c0_i32_0 : i32, i32, i32
  }
  func.func @transform_1(%arg0: i32, %arg1: i32) -> (i32, i32) {
    %c0_i32 = arith.constant 0 : i32
    %c0_i32_0 = arith.constant 0 : i32
    %c0_i32_1 = arith.constant 0 : i32
    return %c0_i32, %c0_i32_0 : i32, i32
  }
  func.func @transform_2(%arg0: i32, %arg1: i32) -> (i32, i32) {
    %c0_i32 = arith.constant 0 : i32
    %c0_i32_0 = arith.constant 0 : i32
    %c0_i32_1 = arith.constant 0 : i32
    return %c0_i32, %c0_i32_0 : i32, i32
  }
  func.func @transform_3(%arg0: i32, %arg1: i32) -> (i32, i32, i32) {
    %c0_i32 = arith.constant 0 : i32
    %c0_i32_0 = arith.constant 0 : i32
    return %arg0, %c0_i32, %arg1 : i32, i32, i32
  }
}

module attributes {stable_mosaic.version = 11 : i64} {
  func.func @kernel(%arg0: i32, %arg1: i32, %arg2: memref<1x8x512xf32, #tpu.memory_space<vmem>>, %arg3: memref<8x72xf32, #tpu.memory_space<vmem>>, %arg4: memref<8x1xf32, #tpu.memory_space<vmem>>, %arg5: memref<384x1xf32, #tpu.memory_space<vmem>>, %arg6: memref<1x8x384xf32, #tpu.memory_space<vmem>>, %arg7: memref<1x8x1xf32, #tpu.memory_space<vmem>>, %arg8: memref<1x8x1xf32, #tpu.memory_space<vmem>>, %arg9: memref<72x384xf32, #tpu.memory_space<vmem>>) attributes {dimension_semantics = [#tpu.dimension_semantics<parallel>, #tpu.dimension_semantics<arbitrary>], iteration_bounds = array<i64: 2, 1>, scalar_prefetch = 0 : i64, scratch_operands = 1 : i64, tpu.core_type = #tpu.core_type<tc>, window_params = [{transform_indices = @transform_0, window_bounds = array<i64: 1, 8, 512>}, {pipeline_mode = #tpu.pipeline_mode<synchronous>, transform_indices = @transform_1, window_bounds = array<i64: 8, 72>}, {pipeline_mode = #tpu.pipeline_mode<synchronous>, transform_indices = @transform_2, window_bounds = array<i64: 8, 1>}, {transform_indices = @transform_3, window_bounds = array<i64: 384, 1>}, {transform_indices = @transform_4, window_bounds = array<i64: 1, 8, 384>}, {transform_indices = @transform_5, window_bounds = array<i64: 1, 8, 1>}, {transform_indices = @transform_6, window_bounds = array<i64: 1, 8, 1>}]} {
    %c384_i32 = arith.constant 384 : i32
    %0 = arith.muli %arg1, %c384_i32 : i32
    %1 = tpu.assume_multiple %0, 128 : i32
    %c0 = arith.constant 0 : index
    %c0_0 = arith.constant 0 : index
    %2 = arith.index_cast %1 : i32 to index
    %3 = vector.load %arg2[%c0, %c0_0, %2] : memref<1x8x512xf32, #tpu.memory_space<vmem>>, vector<1x8x512xf32>
    %4 = vector.shape_cast %3 : vector<1x8x512xf32> to vector<8x512xf32>
    %5 = vector.extract_strided_slice %4 {offsets = [0, 0], sizes = [8, 384], strides = [1, 1]} : vector<8x512xf32> to vector<8x384xf32>
    %c0_1 = arith.constant 0 : index
    %c0_2 = arith.constant 0 : index
    %6 = vector.load %arg9[%c0_1, %c0_2] : memref<72x384xf32, #tpu.memory_space<vmem>>, vector<8x384xf32>
    tpu.vector_store %arg9[%c0_1, %c0_2], %5 {strides = array<i32>} : memref<72x384xf32, #tpu.memory_space<vmem>>, vector<8x384xf32>,
    %7 = vector.extract_strided_slice %4 {offsets = [0, 1], sizes = [8, 384], strides = [1, 1]} : vector<8x512xf32> to vector<8x384xf32>
    %c8 = arith.constant 8 : index
    %c0_3 = arith.constant 0 : index
    %8 = vector.load %arg9[%c8, %c0_3] : memref<72x384xf32, #tpu.memory_space<vmem>>, vector<8x384xf32>
    tpu.vector_store %arg9[%c8, %c0_3], %7 {strides = array<i32>} : memref<72x384xf32, #tpu.memory_space<vmem>>, vector<8x384xf32>,
    %9 = vector.extract_strided_slice %4 {offsets = [0, 2], sizes = [8, 384], strides = [1, 1]} : vector<8x512xf32> to vector<8x384xf32>
    %c16 = arith.constant 16 : index
    %c0_4 = arith.constant 0 : index
    %10 = vector.load %arg9[%c16, %c0_4] : memref<72x384xf32, #tpu.memory_space<vmem>>, vector<8x384xf32>
    tpu.vector_store %arg9[%c16, %c0_4], %9 {strides = array<i32>} : memref<72x384xf32, #tpu.memory_space<vmem>>, vector<8x384xf32>,
    %11 = vector.extract_strided_slice %4 {offsets = [0, 18], sizes = [8, 384], strides = [1, 1]} : vector<8x512xf32> to vector<8x384xf32>
    %c24 = arith.constant 24 : index
    %c0_5 = arith.constant 0 : index
    %12 = vector.load %arg9[%c24, %c0_5] : memref<72x384xf32, #tpu.memory_space<vmem>>, vector<8x384xf32>
    tpu.vector_store %arg9[%c24, %c0_5], %11 {strides = array<i32>} : memref<72x384xf32, #tpu.memory_space<vmem>>, vector<8x384xf32>,
    %13 = vector.extract_strided_slice %4 {offsets = [0, 19], sizes = [8, 384], strides = [1, 1]} : vector<8x512xf32> to vector<8x384xf32>
    %c32 = arith.constant 32 : index
    %c0_6 = arith.constant 0 : index
    %14 = vector.load %arg9[%c32, %c0_6] : memref<72x384xf32, #tpu.memory_space<vmem>>, vector<8x384xf32>
    tpu.vector_store %arg9[%c32, %c0_6], %13 {strides = array<i32>} : memref<72x384xf32, #tpu.memory_space<vmem>>, vector<8x384xf32>,
    %15 = vector.extract_strided_slice %4 {offsets = [0, 20], sizes = [8, 384], strides = [1, 1]} : vector<8x512xf32> to vector<8x384xf32>
    %c40 = arith.constant 40 : index
    %c0_7 = arith.constant 0 : index
    %16 = vector.load %arg9[%c40, %c0_7] : memref<72x384xf32, #tpu.memory_space<vmem>>, vector<8x384xf32>
    tpu.vector_store %arg9[%c40, %c0_7], %15 {strides = array<i32>} : memref<72x384xf32, #tpu.memory_space<vmem>>, vector<8x384xf32>,
    %17 = vector.extract_strided_slice %4 {offsets = [0, 36], sizes = [8, 384], strides = [1, 1]} : vector<8x512xf32> to vector<8x384xf32>
    %c48 = arith.constant 48 : index
    %c0_8 = arith.constant 0 : index
    %18 = vector.load %arg9[%c48, %c0_8] : memref<72x384xf32, #tpu.memory_space<vmem>>, vector<8x384xf32>
    tpu.vector_store %arg9[%c48, %c0_8], %17 {strides = array<i32>} : memref<72x384xf32, #tpu.memory_space<vmem>>, vector<8x384xf32>,
    %19 = vector.extract_strided_slice %4 {offsets = [0, 37], sizes = [8, 384], strides = [1, 1]} : vector<8x512xf32> to vector<8x384xf32>
    %c56 = arith.constant 56 : index
    %c0_9 = arith.constant 0 : index
    %20 = vector.load %arg9[%c56, %c0_9] : memref<72x384xf32, #tpu.memory_space<vmem>>, vector<8x384xf32>
    tpu.vector_store %arg9[%c56, %c0_9], %19 {strides = array<i32>} : memref<72x384xf32, #tpu.memory_space<vmem>>, vector<8x384xf32>,
    %21 = vector.extract_strided_slice %4 {offsets = [0, 38], sizes = [8, 384], strides = [1, 1]} : vector<8x512xf32> to vector<8x384xf32>
    %c64 = arith.constant 64 : index
    %c0_10 = arith.constant 0 : index
    %22 = vector.load %arg9[%c64, %c0_10] : memref<72x384xf32, #tpu.memory_space<vmem>>, vector<8x384xf32>
    tpu.vector_store %arg9[%c64, %c0_10], %21 {strides = array<i32>} : memref<72x384xf32, #tpu.memory_space<vmem>>, vector<8x384xf32>,
    %c0_11 = arith.constant 0 : index
    %c0_12 = arith.constant 0 : index
    %23 = vector.load %arg3[%c0_11, %c0_12] : memref<8x72xf32, #tpu.memory_space<vmem>>, vector<8x72xf32>
    %c0_13 = arith.constant 0 : index
    %c0_14 = arith.constant 0 : index
    %24 = vector.load %arg9[%c0_13, %c0_14] : memref<72x384xf32, #tpu.memory_space<vmem>>, vector<72x384xf32>
    %cst = arith.constant dense<0.000000e+00> : vector<8x384xf32>
    %25 = tpu.matmul %23, %24, %cst {dimension_numbers = #tpu.dot_dimension_numbers<[1], [0], [0], [1], [0, 0, 1, 1], [], []>} : vector<8x72xf32>, vector<72x384xf32>, vector<8x384xf32> -> vector<8x384xf32>
    %c0_15 = arith.constant 0 : index
    %c0_16 = arith.constant 0 : index
    %26 = vector.load %arg4[%c0_15, %c0_16] : memref<8x1xf32, #tpu.memory_space<vmem>>, vector<8x1xf32>
    %27 = vector.broadcast %26 : vector<8x1xf32> to vector<8x384xf32>
    %28 = arith.addf %25, %27 : vector<8x384xf32>
    %cst_17 = arith.constant 0.000000e+00 : f32
    %29 = vector.broadcast %cst_17 : f32 to vector<8x384xf32>
    %30 = arith.cmpf oge, %28, %29 : vector<8x384xf32>
    %cst_18 = arith.constant 0.00999999977 : f32
    %31 = vector.broadcast %cst_18 : f32 to vector<8x384xf32>
    %32 = arith.mulf %31, %28 : vector<8x384xf32>
    %33 = arith.select %30, %28, %32 : vector<8x384xi1>, vector<8x384xf32>
    %c0_19 = arith.constant 0 : index
    %c0_20 = arith.constant 0 : index
    %c0_21 = arith.constant 0 : index
    %34 = vector.load %arg6[%c0_19, %c0_20, %c0_21] : memref<1x8x384xf32, #tpu.memory_space<vmem>>, vector<1x8x384xf32>
    %35 = vector.shape_cast %34 : vector<1x8x384xf32> to vector<8x384xf32>
    %36 = vector.shape_cast %33 : vector<8x384xf32> to vector<1x8x384xf32>
    tpu.vector_store %arg6[%c0_19, %c0_20, %c0_21], %36 {strides = array<i32>} : memref<1x8x384xf32, #tpu.memory_space<vmem>>, vector<1x8x384xf32>,
    %c0_22 = arith.constant 0 : index
    %c0_23 = arith.constant 0 : index
    %37 = vector.load %arg5[%c0_22, %c0_23] : memref<384x1xf32, #tpu.memory_space<vmem>>, vector<384x1xf32>
    %cst_24 = arith.constant dense<0.000000e+00> : vector<8x1xf32>
    %38 = tpu.matmul %33, %37, %cst_24 {dimension_numbers = #tpu.dot_dimension_numbers<[1], [0], [0], [1], [0, 0, 1, 1], [], []>} : vector<8x384xf32>, vector<384x1xf32>, vector<8x1xf32> -> vector<8x1xf32>
    %39 = arith.mulf %33, %33 : vector<8x384xf32>
    %cst_25 = arith.constant dense<0.000000e+00> : vector<8x1xf32>
    %40 = tpu.matmul %39, %37, %cst_25 {dimension_numbers = #tpu.dot_dimension_numbers<[1], [0], [0], [1], [0, 0, 1, 1], [], []>} : vector<8x384xf32>, vector<384x1xf32>, vector<8x1xf32> -> vector<8x1xf32>
    %c0_i32 = arith.constant 0 : i32
    %41 = arith.cmpi eq, %arg1, %c0_i32 : i32
    %42 = arith.extui %41 : i1 to i32
    %c0_i32_26 = arith.constant 0 : i32
    %43 = arith.cmpi ne, %42, %c0_i32_26 : i32
    scf.if %43 {
      %c0_29 = arith.constant 0 : index
      %c0_30 = arith.constant 0 : index
      %c0_31 = arith.constant 0 : index
      %47 = vector.load %arg7[%c0_29, %c0_30, %c0_31] : memref<1x8x1xf32, #tpu.memory_space<vmem>>, vector<1x8x1xf32>
      %48 = vector.shape_cast %47 : vector<1x8x1xf32> to vector<8x1xf32>
      %49 = vector.shape_cast %38 : vector<8x1xf32> to vector<1x8x1xf32>
      tpu.vector_store %arg7[%c0_29, %c0_30, %c0_31], %49 {strides = array<i32>} : memref<1x8x1xf32, #tpu.memory_space<vmem>>, vector<1x8x1xf32>,
      %c0_32 = arith.constant 0 : index
      %c0_33 = arith.constant 0 : index
      %c0_34 = arith.constant 0 : index
      %50 = vector.load %arg8[%c0_32, %c0_33, %c0_34] : memref<1x8x1xf32, #tpu.memory_space<vmem>>, vector<1x8x1xf32>
      %51 = vector.shape_cast %50 : vector<1x8x1xf32> to vector<8x1xf32>
      %52 = vector.shape_cast %40 : vector<8x1xf32> to vector<1x8x1xf32>
      tpu.vector_store %arg8[%c0_32, %c0_33, %c0_34], %52 {strides = array<i32>} : memref<1x8x1xf32, #tpu.memory_space<vmem>>, vector<1x8x1xf32>,
    } else {
    }
    %c0_i32_27 = arith.constant 0 : i32
    %44 = arith.cmpi ne, %arg1, %c0_i32_27 : i32
    %45 = arith.extui %44 : i1 to i32
    %c0_i32_28 = arith.constant 0 : i32
    %46 = arith.cmpi ne, %45, %c0_i32_28 : i32
    scf.if %46 {
      %c0_29 = arith.constant 0 : index
      %c0_30 = arith.constant 0 : index
      %c0_31 = arith.constant 0 : index
      %47 = vector.load %arg7[%c0_29, %c0_30, %c0_31] : memref<1x8x1xf32, #tpu.memory_space<vmem>>, vector<1x8x1xf32>
      %48 = vector.shape_cast %47 : vector<1x8x1xf32> to vector<8x1xf32>
      %49 = arith.addf %48, %38 : vector<8x1xf32>
      %c0_32 = arith.constant 0 : index
      %c0_33 = arith.constant 0 : index
      %c0_34 = arith.constant 0 : index
      %50 = vector.load %arg7[%c0_32, %c0_33, %c0_34] : memref<1x8x1xf32, #tpu.memory_space<vmem>>, vector<1x8x1xf32>
      %51 = vector.shape_cast %50 : vector<1x8x1xf32> to vector<8x1xf32>
      %52 = vector.shape_cast %49 : vector<8x1xf32> to vector<1x8x1xf32>
      tpu.vector_store %arg7[%c0_32, %c0_33, %c0_34], %52 {strides = array<i32>} : memref<1x8x1xf32, #tpu.memory_space<vmem>>, vector<1x8x1xf32>,
      %c0_35 = arith.constant 0 : index
      %c0_36 = arith.constant 0 : index
      %c0_37 = arith.constant 0 : index
      %53 = vector.load %arg8[%c0_35, %c0_36, %c0_37] : memref<1x8x1xf32, #tpu.memory_space<vmem>>, vector<1x8x1xf32>
      %54 = vector.shape_cast %53 : vector<1x8x1xf32> to vector<8x1xf32>
      %55 = arith.addf %54, %40 : vector<8x1xf32>
      %c0_38 = arith.constant 0 : index
      %c0_39 = arith.constant 0 : index
      %c0_40 = arith.constant 0 : index
      %56 = vector.load %arg8[%c0_38, %c0_39, %c0_40] : memref<1x8x1xf32, #tpu.memory_space<vmem>>, vector<1x8x1xf32>
      %57 = vector.shape_cast %56 : vector<1x8x1xf32> to vector<8x1xf32>
      %58 = vector.shape_cast %55 : vector<8x1xf32> to vector<1x8x1xf32>
      tpu.vector_store %arg8[%c0_38, %c0_39, %c0_40], %58 {strides = array<i32>} : memref<1x8x1xf32, #tpu.memory_space<vmem>>, vector<1x8x1xf32>,
    } else {
    }
    return
  }
  func.func @transform_0(%arg0: i32, %arg1: i32) -> (i32, i32, i32) {
    %c0_i32 = arith.constant 0 : i32
    %c0_i32_0 = arith.constant 0 : i32
    %c0_i32_1 = arith.constant 0 : i32
    return %arg0, %c0_i32, %c0_i32_0 : i32, i32, i32
  }
  func.func @transform_1(%arg0: i32, %arg1: i32) -> (i32, i32) {
    %c0_i32 = arith.constant 0 : i32
    %c0_i32_0 = arith.constant 0 : i32
    %c0_i32_1 = arith.constant 0 : i32
    return %c0_i32, %c0_i32_0 : i32, i32
  }
  func.func @transform_2(%arg0: i32, %arg1: i32) -> (i32, i32) {
    %c0_i32 = arith.constant 0 : i32
    %c0_i32_0 = arith.constant 0 : i32
    %c0_i32_1 = arith.constant 0 : i32
    return %c0_i32, %c0_i32_0 : i32, i32
  }
  func.func @transform_3(%arg0: i32, %arg1: i32) -> (i32, i32) {
    %c0_i32 = arith.constant 0 : i32
    %c0_i32_0 = arith.constant 0 : i32
    return %arg1, %c0_i32 : i32, i32
  }
  func.func @transform_4(%arg0: i32, %arg1: i32) -> (i32, i32, i32) {
    %c0_i32 = arith.constant 0 : i32
    %c0_i32_0 = arith.constant 0 : i32
    return %arg0, %c0_i32, %arg1 : i32, i32, i32
  }
  func.func @transform_5(%arg0: i32, %arg1: i32) -> (i32, i32, i32) {
    %c0_i32 = arith.constant 0 : i32
    %c0_i32_0 = arith.constant 0 : i32
    %c0_i32_1 = arith.constant 0 : i32
    return %arg0, %c0_i32, %c0_i32_0 : i32, i32, i32
  }
  func.func @transform_6(%arg0: i32, %arg1: i32) -> (i32, i32, i32) {
    %c0_i32 = arith.constant 0 : i32
    %c0_i32_0 = arith.constant 0 : i32
    %c0_i32_1 = arith.constant 0 : i32
    return %arg0, %c0_i32, %c0_i32_0 : i32, i32, i32
  }
}

module attributes {stable_mosaic.version = 11 : i64} {
  func.func @kernel(%arg0: i32, %arg1: i32, %arg2: memref<1x8x512xf32, #tpu.memory_space<vmem>>, %arg3: memref<8x72xf32, #tpu.memory_space<vmem>>, %arg4: memref<8x1xf32, #tpu.memory_space<vmem>>, %arg5: memref<8x1xf32, #tpu.memory_space<vmem>>, %arg6: memref<8x1xf32, #tpu.memory_space<vmem>>, %arg7: memref<384x1xf32, #tpu.memory_space<vmem>>, %arg8: memref<1x8x384xf32, #tpu.memory_space<vmem>>, %arg9: memref<1x8x1xf32, #tpu.memory_space<vmem>>, %arg10: memref<1x8x1xf32, #tpu.memory_space<vmem>>, %arg11: memref<72x384xf32, #tpu.memory_space<vmem>>) attributes {dimension_semantics = [#tpu.dimension_semantics<parallel>, #tpu.dimension_semantics<arbitrary>], iteration_bounds = array<i64: 2, 1>, scalar_prefetch = 0 : i64, scratch_operands = 1 : i64, tpu.core_type = #tpu.core_type<tc>, window_params = [{transform_indices = @transform_0, window_bounds = array<i64: 1, 8, 512>}, {pipeline_mode = #tpu.pipeline_mode<synchronous>, transform_indices = @transform_1, window_bounds = array<i64: 8, 72>}, {pipeline_mode = #tpu.pipeline_mode<synchronous>, transform_indices = @transform_2, window_bounds = array<i64: 8, 1>}, {pipeline_mode = #tpu.pipeline_mode<synchronous>, transform_indices = @transform_3, window_bounds = array<i64: 8, 1>}, {pipeline_mode = #tpu.pipeline_mode<synchronous>, transform_indices = @transform_4, window_bounds = array<i64: 8, 1>}, {transform_indices = @transform_5, window_bounds = array<i64: 384, 1>}, {transform_indices = @transform_6, window_bounds = array<i64: 1, 8, 384>}, {transform_indices = @transform_7, window_bounds = array<i64: 1, 8, 1>}, {transform_indices = @transform_8, window_bounds = array<i64: 1, 8, 1>}]} {
    %c384_i32 = arith.constant 384 : i32
    %0 = arith.muli %arg1, %c384_i32 : i32
    %1 = tpu.assume_multiple %0, 128 : i32
    %c0 = arith.constant 0 : index
    %c0_0 = arith.constant 0 : index
    %2 = arith.index_cast %1 : i32 to index
    %3 = vector.load %arg2[%c0, %c0_0, %2] : memref<1x8x512xf32, #tpu.memory_space<vmem>>, vector<1x8x512xf32>
    %4 = vector.shape_cast %3 : vector<1x8x512xf32> to vector<8x512xf32>
    %c0_1 = arith.constant 0 : index
    %c0_2 = arith.constant 0 : index
    %5 = vector.load %arg5[%c0_1, %c0_2] : memref<8x1xf32, #tpu.memory_space<vmem>>, vector<8x1xf32>
    %6 = vector.broadcast %5 : vector<8x1xf32> to vector<8x512xf32>
    %7 = arith.mulf %4, %6 : vector<8x512xf32>
    %c0_3 = arith.constant 0 : index
    %c0_4 = arith.constant 0 : index
    %8 = vector.load %arg6[%c0_3, %c0_4] : memref<8x1xf32, #tpu.memory_space<vmem>>, vector<8x1xf32>
    %9 = vector.broadcast %8 : vector<8x1xf32> to vector<8x512xf32>
    %10 = arith.addf %7, %9 : vector<8x512xf32>
    %cst = arith.constant 0.000000e+00 : f32
    %11 = vector.broadcast %cst : f32 to vector<8x512xf32>
    %12 = arith.maximumf %10, %11 : vector<8x512xf32>
    %13 = vector.extract_strided_slice %12 {offsets = [0, 0], sizes = [8, 384], strides = [1, 1]} : vector<8x512xf32> to vector<8x384xf32>
    %c0_5 = arith.constant 0 : index
    %c0_6 = arith.constant 0 : index
    %14 = vector.load %arg11[%c0_5, %c0_6] : memref<72x384xf32, #tpu.memory_space<vmem>>, vector<8x384xf32>
    tpu.vector_store %arg11[%c0_5, %c0_6], %13 {strides = array<i32>} : memref<72x384xf32, #tpu.memory_space<vmem>>, vector<8x384xf32>,
    %15 = vector.extract_strided_slice %12 {offsets = [0, 1], sizes = [8, 384], strides = [1, 1]} : vector<8x512xf32> to vector<8x384xf32>
    %c8 = arith.constant 8 : index
    %c0_7 = arith.constant 0 : index
    %16 = vector.load %arg11[%c8, %c0_7] : memref<72x384xf32, #tpu.memory_space<vmem>>, vector<8x384xf32>
    tpu.vector_store %arg11[%c8, %c0_7], %15 {strides = array<i32>} : memref<72x384xf32, #tpu.memory_space<vmem>>, vector<8x384xf32>,
    %17 = vector.extract_strided_slice %12 {offsets = [0, 2], sizes = [8, 384], strides = [1, 1]} : vector<8x512xf32> to vector<8x384xf32>
    %c16 = arith.constant 16 : index
    %c0_8 = arith.constant 0 : index
    %18 = vector.load %arg11[%c16, %c0_8] : memref<72x384xf32, #tpu.memory_space<vmem>>, vector<8x384xf32>
    tpu.vector_store %arg11[%c16, %c0_8], %17 {strides = array<i32>} : memref<72x384xf32, #tpu.memory_space<vmem>>, vector<8x384xf32>,
    %19 = vector.extract_strided_slice %12 {offsets = [0, 18], sizes = [8, 384], strides = [1, 1]} : vector<8x512xf32> to vector<8x384xf32>
    %c24 = arith.constant 24 : index
    %c0_9 = arith.constant 0 : index
    %20 = vector.load %arg11[%c24, %c0_9] : memref<72x384xf32, #tpu.memory_space<vmem>>, vector<8x384xf32>
    tpu.vector_store %arg11[%c24, %c0_9], %19 {strides = array<i32>} : memref<72x384xf32, #tpu.memory_space<vmem>>, vector<8x384xf32>,
    %21 = vector.extract_strided_slice %12 {offsets = [0, 19], sizes = [8, 384], strides = [1, 1]} : vector<8x512xf32> to vector<8x384xf32>
    %c32 = arith.constant 32 : index
    %c0_10 = arith.constant 0 : index
    %22 = vector.load %arg11[%c32, %c0_10] : memref<72x384xf32, #tpu.memory_space<vmem>>, vector<8x384xf32>
    tpu.vector_store %arg11[%c32, %c0_10], %21 {strides = array<i32>} : memref<72x384xf32, #tpu.memory_space<vmem>>, vector<8x384xf32>,
    %23 = vector.extract_strided_slice %12 {offsets = [0, 20], sizes = [8, 384], strides = [1, 1]} : vector<8x512xf32> to vector<8x384xf32>
    %c40 = arith.constant 40 : index
    %c0_11 = arith.constant 0 : index
    %24 = vector.load %arg11[%c40, %c0_11] : memref<72x384xf32, #tpu.memory_space<vmem>>, vector<8x384xf32>
    tpu.vector_store %arg11[%c40, %c0_11], %23 {strides = array<i32>} : memref<72x384xf32, #tpu.memory_space<vmem>>, vector<8x384xf32>,
    %25 = vector.extract_strided_slice %12 {offsets = [0, 36], sizes = [8, 384], strides = [1, 1]} : vector<8x512xf32> to vector<8x384xf32>
    %c48 = arith.constant 48 : index
    %c0_12 = arith.constant 0 : index
    %26 = vector.load %arg11[%c48, %c0_12] : memref<72x384xf32, #tpu.memory_space<vmem>>, vector<8x384xf32>
    tpu.vector_store %arg11[%c48, %c0_12], %25 {strides = array<i32>} : memref<72x384xf32, #tpu.memory_space<vmem>>, vector<8x384xf32>,
    %27 = vector.extract_strided_slice %12 {offsets = [0, 37], sizes = [8, 384], strides = [1, 1]} : vector<8x512xf32> to vector<8x384xf32>
    %c56 = arith.constant 56 : index
    %c0_13 = arith.constant 0 : index
    %28 = vector.load %arg11[%c56, %c0_13] : memref<72x384xf32, #tpu.memory_space<vmem>>, vector<8x384xf32>
    tpu.vector_store %arg11[%c56, %c0_13], %27 {strides = array<i32>} : memref<72x384xf32, #tpu.memory_space<vmem>>, vector<8x384xf32>,
    %29 = vector.extract_strided_slice %12 {offsets = [0, 38], sizes = [8, 384], strides = [1, 1]} : vector<8x512xf32> to vector<8x384xf32>
    %c64 = arith.constant 64 : index
    %c0_14 = arith.constant 0 : index
    %30 = vector.load %arg11[%c64, %c0_14] : memref<72x384xf32, #tpu.memory_space<vmem>>, vector<8x384xf32>
    tpu.vector_store %arg11[%c64, %c0_14], %29 {strides = array<i32>} : memref<72x384xf32, #tpu.memory_space<vmem>>, vector<8x384xf32>,
    %c0_15 = arith.constant 0 : index
    %c0_16 = arith.constant 0 : index
    %31 = vector.load %arg3[%c0_15, %c0_16] : memref<8x72xf32, #tpu.memory_space<vmem>>, vector<8x72xf32>
    %c0_17 = arith.constant 0 : index
    %c0_18 = arith.constant 0 : index
    %32 = vector.load %arg11[%c0_17, %c0_18] : memref<72x384xf32, #tpu.memory_space<vmem>>, vector<72x384xf32>
    %cst_19 = arith.constant dense<0.000000e+00> : vector<8x384xf32>
    %33 = tpu.matmul %31, %32, %cst_19 {dimension_numbers = #tpu.dot_dimension_numbers<[1], [0], [0], [1], [0, 0, 1, 1], [], []>} : vector<8x72xf32>, vector<72x384xf32>, vector<8x384xf32> -> vector<8x384xf32>
    %c0_20 = arith.constant 0 : index
    %c0_21 = arith.constant 0 : index
    %34 = vector.load %arg4[%c0_20, %c0_21] : memref<8x1xf32, #tpu.memory_space<vmem>>, vector<8x1xf32>
    %35 = vector.broadcast %34 : vector<8x1xf32> to vector<8x384xf32>
    %36 = arith.addf %33, %35 : vector<8x384xf32>
    %cst_22 = arith.constant 0.000000e+00 : f32
    %37 = vector.broadcast %cst_22 : f32 to vector<8x384xf32>
    %38 = arith.cmpf oge, %36, %37 : vector<8x384xf32>
    %cst_23 = arith.constant 0.00999999977 : f32
    %39 = vector.broadcast %cst_23 : f32 to vector<8x384xf32>
    %40 = arith.mulf %39, %36 : vector<8x384xf32>
    %41 = arith.select %38, %36, %40 : vector<8x384xi1>, vector<8x384xf32>
    %c0_24 = arith.constant 0 : index
    %c0_25 = arith.constant 0 : index
    %c0_26 = arith.constant 0 : index
    %42 = vector.load %arg8[%c0_24, %c0_25, %c0_26] : memref<1x8x384xf32, #tpu.memory_space<vmem>>, vector<1x8x384xf32>
    %43 = vector.shape_cast %42 : vector<1x8x384xf32> to vector<8x384xf32>
    %44 = vector.shape_cast %41 : vector<8x384xf32> to vector<1x8x384xf32>
    tpu.vector_store %arg8[%c0_24, %c0_25, %c0_26], %44 {strides = array<i32>} : memref<1x8x384xf32, #tpu.memory_space<vmem>>, vector<1x8x384xf32>,
    %c0_27 = arith.constant 0 : index
    %c0_28 = arith.constant 0 : index
    %45 = vector.load %arg7[%c0_27, %c0_28] : memref<384x1xf32, #tpu.memory_space<vmem>>, vector<384x1xf32>
    %cst_29 = arith.constant dense<0.000000e+00> : vector<8x1xf32>
    %46 = tpu.matmul %41, %45, %cst_29 {dimension_numbers = #tpu.dot_dimension_numbers<[1], [0], [0], [1], [0, 0, 1, 1], [], []>} : vector<8x384xf32>, vector<384x1xf32>, vector<8x1xf32> -> vector<8x1xf32>
    %47 = arith.mulf %41, %41 : vector<8x384xf32>
    %cst_30 = arith.constant dense<0.000000e+00> : vector<8x1xf32>
    %48 = tpu.matmul %47, %45, %cst_30 {dimension_numbers = #tpu.dot_dimension_numbers<[1], [0], [0], [1], [0, 0, 1, 1], [], []>} : vector<8x384xf32>, vector<384x1xf32>, vector<8x1xf32> -> vector<8x1xf32>
    %c0_i32 = arith.constant 0 : i32
    %49 = arith.cmpi eq, %arg1, %c0_i32 : i32
    %50 = arith.extui %49 : i1 to i32
    %c0_i32_31 = arith.constant 0 : i32
    %51 = arith.cmpi ne, %50, %c0_i32_31 : i32
    scf.if %51 {
      %c0_34 = arith.constant 0 : index
      %c0_35 = arith.constant 0 : index
      %c0_36 = arith.constant 0 : index
      %55 = vector.load %arg9[%c0_34, %c0_35, %c0_36] : memref<1x8x1xf32, #tpu.memory_space<vmem>>, vector<1x8x1xf32>
      %56 = vector.shape_cast %55 : vector<1x8x1xf32> to vector<8x1xf32>
      %57 = vector.shape_cast %46 : vector<8x1xf32> to vector<1x8x1xf32>
      tpu.vector_store %arg9[%c0_34, %c0_35, %c0_36], %57 {strides = array<i32>} : memref<1x8x1xf32, #tpu.memory_space<vmem>>, vector<1x8x1xf32>,
      %c0_37 = arith.constant 0 : index
      %c0_38 = arith.constant 0 : index
      %c0_39 = arith.constant 0 : index
      %58 = vector.load %arg10[%c0_37, %c0_38, %c0_39] : memref<1x8x1xf32, #tpu.memory_space<vmem>>, vector<1x8x1xf32>
      %59 = vector.shape_cast %58 : vector<1x8x1xf32> to vector<8x1xf32>
      %60 = vector.shape_cast %48 : vector<8x1xf32> to vector<1x8x1xf32>
      tpu.vector_store %arg10[%c0_37, %c0_38, %c0_39], %60 {strides = array<i32>} : memref<1x8x1xf32, #tpu.memory_space<vmem>>, vector<1x8x1xf32>,
    } else {
    }
    %c0_i32_32 = arith.constant 0 : i32
    %52 = arith.cmpi ne, %arg1, %c0_i32_32 : i32
    %53 = arith.extui %52 : i1 to i32
    %c0_i32_33 = arith.constant 0 : i32
    %54 = arith.cmpi ne, %53, %c0_i32_33 : i32
    scf.if %54 {
      %c0_34 = arith.constant 0 : index
      %c0_35 = arith.constant 0 : index
      %c0_36 = arith.constant 0 : index
      %55 = vector.load %arg9[%c0_34, %c0_35, %c0_36] : memref<1x8x1xf32, #tpu.memory_space<vmem>>, vector<1x8x1xf32>
      %56 = vector.shape_cast %55 : vector<1x8x1xf32> to vector<8x1xf32>
      %57 = arith.addf %56, %46 : vector<8x1xf32>
      %c0_37 = arith.constant 0 : index
      %c0_38 = arith.constant 0 : index
      %c0_39 = arith.constant 0 : index
      %58 = vector.load %arg9[%c0_37, %c0_38, %c0_39] : memref<1x8x1xf32, #tpu.memory_space<vmem>>, vector<1x8x1xf32>
      %59 = vector.shape_cast %58 : vector<1x8x1xf32> to vector<8x1xf32>
      %60 = vector.shape_cast %57 : vector<8x1xf32> to vector<1x8x1xf32>
      tpu.vector_store %arg9[%c0_37, %c0_38, %c0_39], %60 {strides = array<i32>} : memref<1x8x1xf32, #tpu.memory_space<vmem>>, vector<1x8x1xf32>,
      %c0_40 = arith.constant 0 : index
      %c0_41 = arith.constant 0 : index
      %c0_42 = arith.constant 0 : index
      %61 = vector.load %arg10[%c0_40, %c0_41, %c0_42] : memref<1x8x1xf32, #tpu.memory_space<vmem>>, vector<1x8x1xf32>
      %62 = vector.shape_cast %61 : vector<1x8x1xf32> to vector<8x1xf32>
      %63 = arith.addf %62, %48 : vector<8x1xf32>
      %c0_43 = arith.constant 0 : index
      %c0_44 = arith.constant 0 : index
      %c0_45 = arith.constant 0 : index
      %64 = vector.load %arg10[%c0_43, %c0_44, %c0_45] : memref<1x8x1xf32, #tpu.memory_space<vmem>>, vector<1x8x1xf32>
      %65 = vector.shape_cast %64 : vector<1x8x1xf32> to vector<8x1xf32>
      %66 = vector.shape_cast %63 : vector<8x1xf32> to vector<1x8x1xf32>
      tpu.vector_store %arg10[%c0_43, %c0_44, %c0_45], %66 {strides = array<i32>} : memref<1x8x1xf32, #tpu.memory_space<vmem>>, vector<1x8x1xf32>,
    } else {
    }
    return
  }
  func.func @transform_0(%arg0: i32, %arg1: i32) -> (i32, i32, i32) {
    %c0_i32 = arith.constant 0 : i32
    %c0_i32_0 = arith.constant 0 : i32
    %c0_i32_1 = arith.constant 0 : i32
    return %arg0, %c0_i32, %c0_i32_0 : i32, i32, i32
  }
  func.func @transform_1(%arg0: i32, %arg1: i32) -> (i32, i32) {
    %c0_i32 = arith.constant 0 : i32
    %c0_i32_0 = arith.constant 0 : i32
    %c0_i32_1 = arith.constant 0 : i32
    return %c0_i32, %c0_i32_0 : i32, i32
  }
  func.func @transform_2(%arg0: i32, %arg1: i32) -> (i32, i32) {
    %c0_i32 = arith.constant 0 : i32
    %c0_i32_0 = arith.constant 0 : i32
    %c0_i32_1 = arith.constant 0 : i32
    return %c0_i32, %c0_i32_0 : i32, i32
  }
  func.func @transform_3(%arg0: i32, %arg1: i32) -> (i32, i32) {
    %c0_i32 = arith.constant 0 : i32
    %c0_i32_0 = arith.constant 0 : i32
    %c0_i32_1 = arith.constant 0 : i32
    return %c0_i32, %c0_i32_0 : i32, i32
  }
  func.func @transform_4(%arg0: i32, %arg1: i32) -> (i32, i32) {
    %c0_i32 = arith.constant 0 : i32
    %c0_i32_0 = arith.constant 0 : i32
    %c0_i32_1 = arith.constant 0 : i32
    return %c0_i32, %c0_i32_0 : i32, i32
  }
  func.func @transform_5(%arg0: i32, %arg1: i32) -> (i32, i32) {
    %c0_i32 = arith.constant 0 : i32
    %c0_i32_0 = arith.constant 0 : i32
    return %arg1, %c0_i32 : i32, i32
  }
  func.func @transform_6(%arg0: i32, %arg1: i32) -> (i32, i32, i32) {
    %c0_i32 = arith.constant 0 : i32
    %c0_i32_0 = arith.constant 0 : i32
    return %arg0, %c0_i32, %arg1 : i32, i32, i32
  }
  func.func @transform_7(%arg0: i32, %arg1: i32) -> (i32, i32, i32) {
    %c0_i32 = arith.constant 0 : i32
    %c0_i32_0 = arith.constant 0 : i32
    %c0_i32_1 = arith.constant 0 : i32
    return %arg0, %c0_i32, %c0_i32_0 : i32, i32, i32
  }
  func.func @transform_8(%arg0: i32, %arg1: i32) -> (i32, i32, i32) {
    %c0_i32 = arith.constant 0 : i32
    %c0_i32_0 = arith.constant 0 : i32
    %c0_i32_1 = arith.constant 0 : i32
    return %arg0, %c0_i32, %c0_i32_0 : i32, i32, i32
  }
}

module attributes {stable_mosaic.version = 11 : i64} {
  func.func @kernel(%arg0: i32, %arg1: i32, %arg2: memref<1x8x512xf32, #tpu.memory_space<vmem>>, %arg3: memref<8x72xf32, #tpu.memory_space<vmem>>, %arg4: memref<8x1xf32, #tpu.memory_space<vmem>>, %arg5: memref<8x1xf32, #tpu.memory_space<vmem>>, %arg6: memref<8x1xf32, #tpu.memory_space<vmem>>, %arg7: memref<1x8x512xf32, #tpu.memory_space<vmem>>, %arg8: memref<1x8x384xf32, #tpu.memory_space<vmem>>, %arg9: memref<72x384xf32, #tpu.memory_space<vmem>>) attributes {dimension_semantics = [#tpu.dimension_semantics<parallel>, #tpu.dimension_semantics<arbitrary>], iteration_bounds = array<i64: 2, 1>, scalar_prefetch = 0 : i64, scratch_operands = 1 : i64, tpu.core_type = #tpu.core_type<tc>, window_params = [{transform_indices = @transform_0, window_bounds = array<i64: 1, 8, 512>}, {pipeline_mode = #tpu.pipeline_mode<synchronous>, transform_indices = @transform_1, window_bounds = array<i64: 8, 72>}, {pipeline_mode = #tpu.pipeline_mode<synchronous>, transform_indices = @transform_2, window_bounds = array<i64: 8, 1>}, {pipeline_mode = #tpu.pipeline_mode<synchronous>, transform_indices = @transform_3, window_bounds = array<i64: 8, 1>}, {pipeline_mode = #tpu.pipeline_mode<synchronous>, transform_indices = @transform_4, window_bounds = array<i64: 8, 1>}, {transform_indices = @transform_5, window_bounds = array<i64: 1, 8, 512>}, {transform_indices = @transform_6, window_bounds = array<i64: 1, 8, 384>}]} {
    %c384_i32 = arith.constant 384 : i32
    %0 = arith.muli %arg1, %c384_i32 : i32
    %1 = tpu.assume_multiple %0, 128 : i32
    %c0 = arith.constant 0 : index
    %c0_0 = arith.constant 0 : index
    %2 = arith.index_cast %1 : i32 to index
    %3 = vector.load %arg2[%c0, %c0_0, %2] : memref<1x8x512xf32, #tpu.memory_space<vmem>>, vector<1x8x512xf32>
    %4 = vector.shape_cast %3 : vector<1x8x512xf32> to vector<8x512xf32>
    %c0_1 = arith.constant 0 : index
    %c0_2 = arith.constant 0 : index
    %5 = vector.load %arg5[%c0_1, %c0_2] : memref<8x1xf32, #tpu.memory_space<vmem>>, vector<8x1xf32>
    %6 = vector.broadcast %5 : vector<8x1xf32> to vector<8x512xf32>
    %7 = arith.mulf %4, %6 : vector<8x512xf32>
    %c0_3 = arith.constant 0 : index
    %c0_4 = arith.constant 0 : index
    %8 = vector.load %arg6[%c0_3, %c0_4] : memref<8x1xf32, #tpu.memory_space<vmem>>, vector<8x1xf32>
    %9 = vector.broadcast %8 : vector<8x1xf32> to vector<8x512xf32>
    %10 = arith.addf %7, %9 : vector<8x512xf32>
    %c0_5 = arith.constant 0 : index
    %c0_6 = arith.constant 0 : index
    %11 = arith.index_cast %1 : i32 to index
    %12 = vector.load %arg7[%c0_5, %c0_6, %11] : memref<1x8x512xf32, #tpu.memory_space<vmem>>, vector<1x8x512xf32>
    %13 = vector.shape_cast %12 : vector<1x8x512xf32> to vector<8x512xf32>
    %14 = arith.addf %10, %13 : vector<8x512xf32>
    %cst = arith.constant 0.000000e+00 : f32
    %15 = vector.broadcast %cst : f32 to vector<8x512xf32>
    %16 = arith.maximumf %14, %15 : vector<8x512xf32>
    %17 = vector.extract_strided_slice %16 {offsets = [0, 0], sizes = [8, 384], strides = [1, 1]} : vector<8x512xf32> to vector<8x384xf32>
    %c0_7 = arith.constant 0 : index
    %c0_8 = arith.constant 0 : index
    %18 = vector.load %arg9[%c0_7, %c0_8] : memref<72x384xf32, #tpu.memory_space<vmem>>, vector<8x384xf32>
    tpu.vector_store %arg9[%c0_7, %c0_8], %17 {strides = array<i32>} : memref<72x384xf32, #tpu.memory_space<vmem>>, vector<8x384xf32>,
    %19 = vector.extract_strided_slice %16 {offsets = [0, 1], sizes = [8, 384], strides = [1, 1]} : vector<8x512xf32> to vector<8x384xf32>
    %c8 = arith.constant 8 : index
    %c0_9 = arith.constant 0 : index
    %20 = vector.load %arg9[%c8, %c0_9] : memref<72x384xf32, #tpu.memory_space<vmem>>, vector<8x384xf32>
    tpu.vector_store %arg9[%c8, %c0_9], %19 {strides = array<i32>} : memref<72x384xf32, #tpu.memory_space<vmem>>, vector<8x384xf32>,
    %21 = vector.extract_strided_slice %16 {offsets = [0, 2], sizes = [8, 384], strides = [1, 1]} : vector<8x512xf32> to vector<8x384xf32>
    %c16 = arith.constant 16 : index
    %c0_10 = arith.constant 0 : index
    %22 = vector.load %arg9[%c16, %c0_10] : memref<72x384xf32, #tpu.memory_space<vmem>>, vector<8x384xf32>
    tpu.vector_store %arg9[%c16, %c0_10], %21 {strides = array<i32>} : memref<72x384xf32, #tpu.memory_space<vmem>>, vector<8x384xf32>,
    %23 = vector.extract_strided_slice %16 {offsets = [0, 18], sizes = [8, 384], strides = [1, 1]} : vector<8x512xf32> to vector<8x384xf32>
    %c24 = arith.constant 24 : index
    %c0_11 = arith.constant 0 : index
    %24 = vector.load %arg9[%c24, %c0_11] : memref<72x384xf32, #tpu.memory_space<vmem>>, vector<8x384xf32>
    tpu.vector_store %arg9[%c24, %c0_11], %23 {strides = array<i32>} : memref<72x384xf32, #tpu.memory_space<vmem>>, vector<8x384xf32>,
    %25 = vector.extract_strided_slice %16 {offsets = [0, 19], sizes = [8, 384], strides = [1, 1]} : vector<8x512xf32> to vector<8x384xf32>
    %c32 = arith.constant 32 : index
    %c0_12 = arith.constant 0 : index
    %26 = vector.load %arg9[%c32, %c0_12] : memref<72x384xf32, #tpu.memory_space<vmem>>, vector<8x384xf32>
    tpu.vector_store %arg9[%c32, %c0_12], %25 {strides = array<i32>} : memref<72x384xf32, #tpu.memory_space<vmem>>, vector<8x384xf32>,
    %27 = vector.extract_strided_slice %16 {offsets = [0, 20], sizes = [8, 384], strides = [1, 1]} : vector<8x512xf32> to vector<8x384xf32>
    %c40 = arith.constant 40 : index
    %c0_13 = arith.constant 0 : index
    %28 = vector.load %arg9[%c40, %c0_13] : memref<72x384xf32, #tpu.memory_space<vmem>>, vector<8x384xf32>
    tpu.vector_store %arg9[%c40, %c0_13], %27 {strides = array<i32>} : memref<72x384xf32, #tpu.memory_space<vmem>>, vector<8x384xf32>,
    %29 = vector.extract_strided_slice %16 {offsets = [0, 36], sizes = [8, 384], strides = [1, 1]} : vector<8x512xf32> to vector<8x384xf32>
    %c48 = arith.constant 48 : index
    %c0_14 = arith.constant 0 : index
    %30 = vector.load %arg9[%c48, %c0_14] : memref<72x384xf32, #tpu.memory_space<vmem>>, vector<8x384xf32>
    tpu.vector_store %arg9[%c48, %c0_14], %29 {strides = array<i32>} : memref<72x384xf32, #tpu.memory_space<vmem>>, vector<8x384xf32>,
    %31 = vector.extract_strided_slice %16 {offsets = [0, 37], sizes = [8, 384], strides = [1, 1]} : vector<8x512xf32> to vector<8x384xf32>
    %c56 = arith.constant 56 : index
    %c0_15 = arith.constant 0 : index
    %32 = vector.load %arg9[%c56, %c0_15] : memref<72x384xf32, #tpu.memory_space<vmem>>, vector<8x384xf32>
    tpu.vector_store %arg9[%c56, %c0_15], %31 {strides = array<i32>} : memref<72x384xf32, #tpu.memory_space<vmem>>, vector<8x384xf32>,
    %33 = vector.extract_strided_slice %16 {offsets = [0, 38], sizes = [8, 384], strides = [1, 1]} : vector<8x512xf32> to vector<8x384xf32>
    %c64 = arith.constant 64 : index
    %c0_16 = arith.constant 0 : index
    %34 = vector.load %arg9[%c64, %c0_16] : memref<72x384xf32, #tpu.memory_space<vmem>>, vector<8x384xf32>
    tpu.vector_store %arg9[%c64, %c0_16], %33 {strides = array<i32>} : memref<72x384xf32, #tpu.memory_space<vmem>>, vector<8x384xf32>,
    %c0_17 = arith.constant 0 : index
    %c0_18 = arith.constant 0 : index
    %35 = vector.load %arg3[%c0_17, %c0_18] : memref<8x72xf32, #tpu.memory_space<vmem>>, vector<8x72xf32>
    %c0_19 = arith.constant 0 : index
    %c0_20 = arith.constant 0 : index
    %36 = vector.load %arg9[%c0_19, %c0_20] : memref<72x384xf32, #tpu.memory_space<vmem>>, vector<72x384xf32>
    %cst_21 = arith.constant dense<0.000000e+00> : vector<8x384xf32>
    %37 = tpu.matmul %35, %36, %cst_21 {dimension_numbers = #tpu.dot_dimension_numbers<[1], [0], [0], [1], [0, 0, 1, 1], [], []>} : vector<8x72xf32>, vector<72x384xf32>, vector<8x384xf32> -> vector<8x384xf32>
    %c0_22 = arith.constant 0 : index
    %c0_23 = arith.constant 0 : index
    %38 = vector.load %arg4[%c0_22, %c0_23] : memref<8x1xf32, #tpu.memory_space<vmem>>, vector<8x1xf32>
    %39 = vector.broadcast %38 : vector<8x1xf32> to vector<8x384xf32>
    %40 = arith.addf %37, %39 : vector<8x384xf32>
    %cst_24 = arith.constant 0.000000e+00 : f32
    %41 = vector.broadcast %cst_24 : f32 to vector<8x384xf32>
    %42 = arith.cmpf oge, %40, %41 : vector<8x384xf32>
    %cst_25 = arith.constant 0.00999999977 : f32
    %43 = vector.broadcast %cst_25 : f32 to vector<8x384xf32>
    %44 = arith.mulf %43, %40 : vector<8x384xf32>
    %45 = arith.select %42, %40, %44 : vector<8x384xi1>, vector<8x384xf32>
    %c0_26 = arith.constant 0 : index
    %c0_27 = arith.constant 0 : index
    %c0_28 = arith.constant 0 : index
    %46 = vector.load %arg8[%c0_26, %c0_27, %c0_28] : memref<1x8x384xf32, #tpu.memory_space<vmem>>, vector<1x8x384xf32>
    %47 = vector.shape_cast %46 : vector<1x8x384xf32> to vector<8x384xf32>
    %48 = vector.shape_cast %45 : vector<8x384xf32> to vector<1x8x384xf32>
    tpu.vector_store %arg8[%c0_26, %c0_27, %c0_28], %48 {strides = array<i32>} : memref<1x8x384xf32, #tpu.memory_space<vmem>>, vector<1x8x384xf32>,
    return
  }
  func.func @transform_0(%arg0: i32, %arg1: i32) -> (i32, i32, i32) {
    %c0_i32 = arith.constant 0 : i32
    %c0_i32_0 = arith.constant 0 : i32
    %c0_i32_1 = arith.constant 0 : i32
    return %arg0, %c0_i32, %c0_i32_0 : i32, i32, i32
  }
  func.func @transform_1(%arg0: i32, %arg1: i32) -> (i32, i32) {
    %c0_i32 = arith.constant 0 : i32
    %c0_i32_0 = arith.constant 0 : i32
    %c0_i32_1 = arith.constant 0 : i32
    return %c0_i32, %c0_i32_0 : i32, i32
  }
  func.func @transform_2(%arg0: i32, %arg1: i32) -> (i32, i32) {
    %c0_i32 = arith.constant 0 : i32
    %c0_i32_0 = arith.constant 0 : i32
    %c0_i32_1 = arith.constant 0 : i32
    return %c0_i32, %c0_i32_0 : i32, i32
  }
  func.func @transform_3(%arg0: i32, %arg1: i32) -> (i32, i32) {
    %c0_i32 = arith.constant 0 : i32
    %c0_i32_0 = arith.constant 0 : i32
    %c0_i32_1 = arith.constant 0 : i32
    return %c0_i32, %c0_i32_0 : i32, i32
  }
  func.func @transform_4(%arg0: i32, %arg1: i32) -> (i32, i32) {
    %c0_i32 = arith.constant 0 : i32
    %c0_i32_0 = arith.constant 0 : i32
    %c0_i32_1 = arith.constant 0 : i32
    return %c0_i32, %c0_i32_0 : i32, i32
  }
  func.func @transform_5(%arg0: i32, %arg1: i32) -> (i32, i32, i32) {
    %c0_i32 = arith.constant 0 : i32
    %c0_i32_0 = arith.constant 0 : i32
    %c0_i32_1 = arith.constant 0 : i32
    return %arg0, %c0_i32, %c0_i32_0 : i32, i32, i32
  }
  func.func @transform_6(%arg0: i32, %arg1: i32) -> (i32, i32, i32) {
    %c0_i32 = arith.constant 0 : i32
    %c0_i32_0 = arith.constant 0 : i32
    return %arg0, %c0_i32, %arg1 : i32, i32, i32
  }
}

</mosaic_0001>

<bundles_post_ra>
// kernel: encoder_forward.4
= control target key start
LH: loop header
LB: loop body
LE: loop exit
PB: predicated region body
PF: predicated region fallthrough
CT: control target
= control target key end

     0   :  { %s774_s12 = smov 0   ;;  %s776_s13 = smov 0   ;;  %s843_s0 = inlined_call_operand.vmem [shape: f32[2,4,512], index: 0, kind: input, shape index: {}]   ;;  %s844_s1 = inlined_call_operand.vmem [shape: f32[8,36], index: 1, kind: input, shape index: {}]   ;;  %s845_s2 = inlined_call_operand.vmem [shape: f32[8,1], index: 2, kind: input, shape index: {}]   ;;  %s846_s3 = inlined_call_operand.vmem [shape: f32[2,8,384], index: 3, kind: output, shape index: {}]  }
   0x1   :  { %s778_s14 = smov 0  }
   0x2 LB: > { %s25_s15 = sadd.s32 1, %s736_s13  ;;  %p631_p0 = scmp.ge.s32.totalorder %s740_s14, 1  ;;  %s740_s14 = sphi %s778_s14, %s13_s14   ;;  %s736_s13 = sphi %s776_s13, %s848_s13   ;;  %s732_s12 = sphi %s774_s12, %s847_s12  }
   0x3   : > { %p27_p1 = scmp.ge.s32.totalorder %s25_s15, 2  ;;  %p151_p2 = scmp.lt.s32.totalorder %s740_s14, 3 }
   0x5   : > { %s850_s15 = smov (%p27_p1, %s25_s15), 0  ;;  %p152_p3 = pnand %p631_p0, %p151_p2 }
   0x6   : > { %p179_p4 = scmp.lt.s32.totalorder (!%p152_p3), %s732_s12, 1  ;;  %s742_s20 = smov (!%p152_p3), 126   ;;  %v745_v6 = vmov (!%p152_p3), 0.0|0.0   ;;  %v750_v7 = vmov (!%p152_p3), 0.0   ;;  %vm752_vm0 = vmmov (!%p152_p3), 0   ;;  %v753_v8 = vmov (!%p152_p3), 0  }
   0x7   : > { %155 = sbr.rel (%p152_p3) target bundleno = 422 (0x1a6), region = 32  ;;  %s743_s21 = smov (!%p152_p3), 127   ;;  %670 = vmatprep.subr.bf16.mxu1 (!%p152_p3), %v745_v6  ;;  %455 = vmatprep.mubr.f32.mxu0 (!%p152_p3), %v750_v7  ;;  %v371_v9 = vld [vmem:[%s845_s2] sm:$0xff] (!%p152_p3)  ;;  %vm237_vm1 = vcmask (!%p152_p3), 1031168   ;;  %vm218_vm2 = vcmask (!%p152_p3), 1039360   ;;  %vm255_vm3 = vcmask (!%p152_p3), 900096  }
   0x8   : > { %s744_s22 = smov (!%p152_p3), 110   ;;  %s746_s23 = smov (!%p152_p3), 109   ;;  %659 = vmatprep.mubr.msk.f32.mxu1 (!%p152_p3), %vm752_vm0, %v750_v7  ;;  %713 = vset.pattern.permute.xlu0 (!%p152_p3), %v753_v8  ;;  %vm273_vm4 = vcmask (!%p152_p3), 891904   ;;  %vm291_vm5 = vcmask (!%p152_p3), 883712   ;;  %vm309_vm6 = vcmask (!%p152_p3), 752640   ;;  %vm327_vm7 = vcmask (!%p152_p3), 744448  }
   0x9   : > { %s747_s24 = smov (!%p152_p3), 108   ;;  %s748_s25 = smov (!%p152_p3), 92   ;;  %vm345_vm8 = vcmask (!%p152_p3), 736256   ;;  %vm381_vm9 = vcmask (!%p152_p3), 1043456   ;;  %vm377_vm10 = vcmask (!%p152_p3), 293888  }
   0xa   : > { %s749_s26 = smov (!%p152_p3), 91   ;;  %s751_s27 = smov (!%p152_p3), 90  }
   0xe   : > { %s852_s12 = smov (!%p179_p4, %s732_s12), 1 }
   0xf   : > { %s642_s16 = sshll.u32 %s852_s12, 4  ;;  %s676_s5 = smul.u32 24, %s852_s12 }
  0x10   : > { %s183_s19 = scalar_lea.vmem %s843_s0, %s642_s16 }
  0x11   : > { %v200_v0 = vld [vmem:[%s183_s19 + $0x8] sm:$0xff]  ;;  %v199_v1 = vld [vmem:[%s183_s19] sm:$0xff]  ;;  %s192_s8 = scalar_lea.vmem %s846_s3, %s676_s5 }
  0x12   : > { %233 = vrot.lane.b32.xlu1 %v200_v0, %s742_s20  ;;  %207 = vst [vmem:[#allocation2 + $0x10] sm:$0xf] %v200_v0  ;;  %212 = vrot.lane.b32.xlu0 %v199_v1, %s743_s21  ;;  %205 = vst [vmem:[#allocation2] sm:$0xf] %v199_v1  ;;  %v203_v2 = vcombine.high %v199_v1, %v199_v1  ;;  %v209_v3 = vcombine.low %v200_v0, %v200_v0 }
  0x13   : > { %v208_v4 = vcombine.low %v199_v1, %v199_v1  ;;  %v228_v5 = vcombine.high %v200_v0, %v200_v0 }
  0x14   : > { %206 = vst [vmem:[#allocation2 + $0x8] sm:$0xf] %v203_v2 }
  0x16   : > { %249 = vrot.lane.b32.xlu0 %v199_v1, %s744_s22  ;;  %231 = vrot.lane.b32.xlu1 %v203_v2, %s742_s20 }
  0x1a   : > { %214 = vrot.lane.b32.xlu0 %v209_v3, %s743_s21  ;;  %251 = vrot.lane.b32.xlu1 %v209_v3, %s744_s22 }
  0x1e   : > { %210 = vrot.lane.b32.xlu0 %v208_v4, %s743_s21  ;;  %229 = vrot.lane.b32.xlu1 %v199_v1, %s742_s20 }
  0x22   : > { %247 = vrot.lane.b32.xlu0 %v208_v4, %s744_s22  ;;  %216 = vrot.lane.b32.xlu1 %v200_v0, %s743_s21 }
  0x26   : > { %235 = vrot.lane.b32.xlu0 %v228_v5, %s742_s20  ;;  %253 = vrot.lane.b32.xlu1 %v200_v0, %s744_s22 }
  0x2a   : > { %267 = vrot.lane.b32.xlu0 %v203_v2, %s746_s23  ;;  %269 = vrot.lane.b32.xlu1 %v200_v0, %s746_s23 }
  0x2e   : > { %285 = vrot.lane.b32.xlu0 %v199_v1, %s747_s24  ;;  %287 = vrot.lane.b32.xlu1 %v209_v3, %s747_s24 }
  0x32   : > { %303 = vrot.lane.b32.xlu0 %v203_v2, %s748_s25  ;;  %305 = vrot.lane.b32.xlu1 %v200_v0, %s748_s25 }
  0x36   : > { %321 = vrot.lane.b32.xlu0 %v199_v1, %s749_s26  ;;  %323 = vrot.lane.b32.xlu1 %v209_v3, %s749_s26 }
  0x3a   : > { %265 = vrot.lane.b32.xlu0 %v199_v1, %s746_s23  ;;  %283 = vrot.lane.b32.xlu1 %v208_v4, %s747_s24 }
  0x3e   : > { %301 = vrot.lane.b32.xlu0 %v199_v1, %s748_s25  ;;  %319 = vrot.lane.b32.xlu1 %v208_v4, %s749_s26 }
  0x42   : > { %271 = vrot.lane.b32.xlu0 %v228_v5, %s746_s23  ;;  %289 = vrot.lane.b32.xlu1 %v200_v0, %s747_s24 }
  0x46   : > { %307 = vrot.lane.b32.xlu0 %v228_v5, %s748_s25  ;;  %325 = vrot.lane.b32.xlu1 %v200_v0, %s749_s26 }
  0x4a   : > { %339 = vrot.lane.b32.xlu0 %v203_v2, %s751_s27  ;;  %341 = vrot.lane.b32.xlu1 %v200_v0, %s751_s27 }
  0x4e   : > { %337 = vrot.lane.b32.xlu0 %v199_v1, %s751_s27  ;;  %343 = vrot.lane.b32.xlu1 %v228_v5, %s751_s27 }
  0x52   : > { %374 = vperm.xlu0 %713, %v371_v9  }
  0x84   : > { %v234_v10 = vpop.permute.xlu1 %233  ;;  %v213_v11 = vpop.permute.xlu0 %212 }
  0x88   : > { %v250_v12 = vpop.permute.xlu0 %249  ;;  %v232_v13 = vpop.permute.xlu1 %231 }
  0x89   : > { %v239_v14 = vsel %vm237_vm1, %v232_v13, %v234_v10 }
  0x8a   : > { %245 = vst [vmem:[#allocation2 + $0x20] sm:$0xf] %v239_v14 }
  0x8c   : > { %v215_v15 = vpop.permute.xlu0 %214  ;;  %v252_v16 = vpop.permute.xlu1 %251 }
  0x8d   : > { %v220_v17 = vsel %vm218_vm2, %v213_v11, %v215_v15  ;;  %v257_v18 = vsel %vm255_vm3, %v250_v12, %v252_v16 }
  0x8e   : > { %226 = vst [vmem:[#allocation2 + $0x8] sm:$0xf0] %v220_v17  ;;  %263 = vst [vmem:[#allocation2 + $0x20] sm:$0xf0] %v257_v18 }
  0x90   : > { %v211_v19 = vpop.permute.xlu0 %210  ;;  %v230_v20 = vpop.permute.xlu1 %229 }
  0x91   : > { %v219_v21 = vsel %vm218_vm2, %v211_v19, %v213_v11  ;;  %v238_v22 = vsel %vm237_vm1, %v230_v20, %v232_v13 }
  0x92   : > { %225 = vst [vmem:[#allocation2] sm:$0xf0] %v219_v21  ;;  %244 = vst [vmem:[#allocation2 + $0x18] sm:$0xf] %v238_v22  ;;  %v355_v22 = vld [vmem:[%s844_s1] sm:$0xff] }
  0x94   : > { %v248_v23 = vpop.permute.xlu0 %247  ;;  %v217_v24 = vpop.permute.xlu1 %216 }
  0x95   : > { %v256_v25 = vsel %vm255_vm3, %v248_v23, %v250_v12  ;;  %v221_v26 = vsel %vm218_vm2, %v215_v15, %v217_v24  ;;  %v357_v27 = vld [vmem:[#allocation2 + $0x8] sm:$0xff]  ;;  %v360_v28 = vld [vmem:[#allocation2 + $0x20] sm:$0xff] }
  0x96   : > { %262 = vst [vmem:[#allocation2 + $0x18] sm:$0xf0] %v256_v25  ;;  %227 = vst [vmem:[#allocation2 + $0x10] sm:$0xf0] %v221_v26  ;;  %v662_v29 = vpack.c.bf16 %v360_v28, %v357_v27 }
  0x98   : > { %v236_v30 = vpop.permute.xlu0 %235  ;;  %v254_v31 = vpop.permute.xlu1 %253  ;;  %663 = vmatprep.subr.bf16.mxu0 %v662_v29 }
  0x99   : > { %v240_v32 = vsel %vm237_vm1, %v234_v10, %v236_v30  ;;  %v258_v33 = vsel %vm255_vm3, %v252_v16, %v254_v31  ;;  %v356_v37 = vld [vmem:[#allocation2] sm:$0xff] }
  0x9a   : > { %246 = vst [vmem:[#allocation2 + $0x28] sm:$0xf] %v240_v32  ;;  %264 = vst [vmem:[#allocation2 + $0x28] sm:$0xf0] %v258_v33 }
  0x9c   : > { %v268_v34 = vpop.permute.xlu0 %267  ;;  %v270_v35 = vpop.permute.xlu1 %269 }
  0x9d   : > { %v275_v36 = vsel %vm273_vm4, %v268_v34, %v270_v35  ;;  %v359_v38 = vld [vmem:[#allocation2 + $0x18] sm:$0xff]  ;;  %v358_v43 = vld [vmem:[#allocation2 + $0x10] sm:$0xff] }
  0x9e   : > { %281 = vst [vmem:[#allocation2 + $0x38] sm:$0xf] %v275_v36  ;;  %v664_v39 = vpack.c.bf16 %v359_v38, %v356_v37 }
  0xa0   : > { %v286_v40 = vpop.permute.xlu0 %285  ;;  %v288_v41 = vpop.permute.xlu1 %287  ;;  %665 = vmatpush1.bf16.msra.mxu0 %v664_v39 }
  0xa1   : > { %v293_v42 = vsel %vm291_vm5, %v286_v40, %v288_v41  ;;  %v361_v44 = vld [vmem:[#allocation2 + $0x28] sm:$0xff] }
  0xa2   : > { %299 = vst [vmem:[#allocation2 + $0x38] sm:$0xf0] %v293_v42  ;;  %v671_v45 = vpack.c.bf16 %v361_v44, %v358_v43 }
  0xa4   : > { %v304_v46 = vpop.permute.xlu0 %303  ;;  %672 = vmatpush3.bf16.msra.mxu1 %v671_v45  ;;  %v306_v47 = vpop.permute.xlu1 %305 }
  0xa5   : > { %v311_v48 = vsel %vm309_vm6, %v304_v46, %v306_v47  ;;  %673 = vmatprep.subr.bf16.mxu1 %v745_v6 }
  0xa6   : > { %317 = vst [vmem:[#allocation2 + $0x50] sm:$0xf] %v311_v48 }
  0xa8   : > { %v322_v49 = vpop.permute.xlu0 %321  ;;  %v324_v50 = vpop.permute.xlu1 %323 }
  0xa9   : > { %v329_v51 = vsel %vm327_vm7, %v322_v49, %v324_v50  ;;  %v363_v60 = vld [vmem:[#allocation2 + $0x38] sm:$0xff] }
  0xaa   : > { %335 = vst [vmem:[#allocation2 + $0x50] sm:$0xf0] %v329_v51 }
  0xac   : > { %v266_v52 = vpop.permute.xlu0 %265  ;;  %v284_v53 = vpop.permute.xlu1 %283 }
  0xad   : > { %v274_v54 = vsel %vm273_vm4, %v266_v52, %v268_v34  ;;  %v292_v55 = vsel %vm291_vm5, %v284_v53, %v286_v40 }
  0xae   : > { %280 = vst [vmem:[#allocation2 + $0x30] sm:$0xf] %v274_v54  ;;  %298 = vst [vmem:[#allocation2 + $0x30] sm:$0xf0] %v292_v55 }
  0xb0   : > { %v302_v56 = vpop.permute.xlu0 %301  ;;  %v320_v57 = vpop.permute.xlu1 %319 }
  0xb1   : > { %v310_v58 = vsel %vm309_vm6, %v302_v56, %v304_v46  ;;  %v328_v59 = vsel %vm327_vm7, %v320_v57, %v322_v49  ;;  %v366_v61 = vld [vmem:[#allocation2 + $0x50] sm:$0xff] }
  0xb2   : > { %316 = vst [vmem:[#allocation2 + $0x48] sm:$0xf] %v310_v58  ;;  %334 = vst [vmem:[#allocation2 + $0x48] sm:$0xf0] %v328_v59  ;;  %v666_v62 = vpack.c.bf16 %v366_v61, %v363_v60 }
  0xb4   : > { %v272_v63 = vpop.permute.xlu0 %271  ;;  %v290_v0 = vpop.permute.xlu1 %289  ;;  %667 = vmatprep.subr.bf16.mxu0 %v666_v62 }
  0xb5   : > { %v276_v1 = vsel %vm273_vm4, %v270_v35, %v272_v63  ;;  %v294_v2 = vsel %vm291_vm5, %v288_v41, %v290_v0  ;;  %v362_v8 = vld [vmem:[#allocation2 + $0x30] sm:$0xff] }
  0xb6   : > { %282 = vst [vmem:[#allocation2 + $0x40] sm:$0xf] %v276_v1  ;;  %300 = vst [vmem:[#allocation2 + $0x40] sm:$0xf0] %v294_v2 }
  0xb8   : > { %v308_v3 = vpop.permute.xlu0 %307  ;;  %v326_v4 = vpop.permute.xlu1 %325 }
  0xb9   : > { %v312_v5 = vsel %vm309_vm6, %v306_v47, %v308_v3  ;;  %v330_v6 = vsel %vm327_vm7, %v324_v50, %v326_v4  ;;  %v365_v9 = vld [vmem:[#allocation2 + $0x48] sm:$0xff] }
  0xba   : > { %318 = vst [vmem:[#allocation2 + $0x58] sm:$0xf] %v312_v5  ;;  %336 = vst [vmem:[#allocation2 + $0x58] sm:$0xf0] %v330_v6  ;;  %v668_v10 = vpack.c.bf16 %v365_v9, %v362_v8 }
  0xbc   : > { %v340_v11 = vpop.permute.xlu0 %339  ;;  %v342_v12 = vpop.permute.xlu1 %341  ;;  %669 = vmatpush1.bf16.msra.mxu0 %v668_v10 }
  0xbd   : > { %v347_v13 = vsel %vm345_vm8, %v340_v11, %v342_v12  ;;  %v364_v18 = vld [vmem:[#allocation2 + $0x40] sm:$0xff] }
  0xbe   : > { %353 = vst [vmem:[#allocation2 + $0x68] sm:$0xf] %v347_v13 }
  0xc0   : > { %v338_v14 = vpop.permute.xlu0 %337  ;;  %v344_v15 = vpop.permute.xlu1 %343 }
  0xc1   : > { %v346_v16 = vsel %vm345_vm8, %v338_v14, %v340_v11  ;;  %v348_v17 = vsel %vm345_vm8, %v342_v12, %v344_v15  ;;  %v367_v19 = vld [vmem:[#allocation2 + $0x58] sm:$0xff] }
  0xc2   : > { %352 = vst [vmem:[#allocation2 + $0x60] sm:$0xf] %v346_v16  ;;  %354 = vst [vmem:[#allocation2 + $0x70] sm:$0xf] %v348_v17  ;;  %v674_v20 = vpack.c.bf16 %v367_v19, %v364_v18 }
  0xc4   : > { %675 = vmatpush3.bf16.msra.mxu1 %v674_v20 }
  0xc5   : > { %v369_v21 = vld [vmem:[#allocation2 + $0x68] sm:$0xf]  ;;  %657 = vmatprep.subr.mxu1 %v750_v7 }
  0xc6   : > { %635 = vmatprep.subr.msk.mxu0 %vm381_vm9, %v369_v21 }
  0xc9   : > { %v368_v23 = vld [vmem:[#allocation2 + $0x60] sm:$0xf]  ;;  %v370_v24 = vld [vmem:[#allocation2 + $0x70] sm:$0xf] }
  0xca   : > { %636 = vmatpush1.msk.msra.mxu0 %vm381_vm9, %v368_v23  ;;  %658 = vmatpush3.msk.msra.mxu1 %vm381_vm9, %v370_v24 }
  0xcb   : > { %637 = vmatmul.mubr.msk.f32.vlgmr.msra.gmra.mrb[0].mxu0 %vm377_vm10, %v355_v22  ;;  %660 = vmatmul.mubr.msk.f32.vlgmr.msra.gmra.mrb[0].mxu1 %vm377_vm10, %v355_v22 }
  0xd1   : > { %v375_v25 = vpop.permute.xlu0 %374 }
 0x19e   : > { %v457_v26 = vpop.f32.mrb[0].mxu0  ;;  %v528_v27 = vpop.f32.mrb[0].mxu1 }
 0x19f   : > { %v458_v28 = vadd.f32 %v457_v26, %v375_v25  ;;  %v529_v29 = vadd.f32 %v528_v27, %v375_v25  ;;  %v459_v30 = vpop.f32.mrb[1].mxu0  ;;  %v661_v7 = vpop.f32.mrb[1].mxu1 }
 0x1a0   : > { %v460_v31 = vadd.f32 %v459_v30, %v375_v25 }
 0x1a1   : > { %vm532_vm11 = vcmp.ge.f32.partialorder %v458_v28, 0.0  ;;  %v535_v32 = vmul.f32 0.01, %v458_v28  ;;  %vm534_vm12 = vcmp.ge.f32.partialorder %v529_v29, 0.0  ;;  %v537_v33 = vmul.f32 0.01, %v529_v29 }
 0x1a2   : > { %vm533_vm13 = vcmp.ge.f32.partialorder %v460_v31, 0.0  ;;  %v536_v34 = vmul.f32 0.01, %v460_v31 }
 0x1a3   : > { %v538_v35 = vsel %vm532_vm11, %v458_v28, %v535_v32  ;;  %v540_v36 = vsel %vm534_vm12, %v529_v29, %v537_v33 }
 0x1a4   : > { %541 = vst [vmem:[%s192_s8] sm:$0xff] %v538_v35  ;;  %543 = vst [vmem:[%s192_s8 + $0x10] sm:$0xff] %v540_v36  ;;  %v539_v37 = vsel %vm533_vm13, %v460_v31, %v536_v34 }
 0x1a5   : > { %542 = vst [vmem:[%s192_s8 + $0x8] sm:$0xff] %v539_v37 }
 0x1a6 PF: > { %s13_s14 = sadd.s32 1, %s740_s14   ;;  %s847_s12 = smov %s736_s13 }
 0x1a7   : > { %p10_p5 = scmp.ge.s32.totalorder %s13_s14, 4   ;;  %s848_s13 = smov %s850_s15 }
 0x1a9   :  { %12 = sbr.rel (!%p10_p5) target bundleno = 2 (0x2), region = 63 }

// kernel: encoder_forward.5
= control target key start
LH: loop header
LB: loop body
LE: loop exit
PB: predicated region body
PF: predicated region fallthrough
CT: control target
= control target key end

     0   :  { %s1718_s21 = smov 0   ;;  %s1720_s22 = smov 0   ;;  %s2070_s0 = inlined_call_operand.vmem [shape: f32[2,8,512], index: 0, kind: input, shape index: {}]   ;;  %s2071_s1 = inlined_call_operand.vmem [shape: f32[8,72], index: 1, kind: input, shape index: {}]   ;;  %s2072_s2 = inlined_call_operand.vmem [shape: f32[8,1], index: 2, kind: input, shape index: {}]   ;;  %s2073_s3 = inlined_call_operand.vmem [shape: f32[384,1], index: 3, kind: input, shape index: {}]   ;;  %s2074_s4 = inlined_call_operand.vmem [shape: f32[2,8,384], index: 4, kind: output, shape index: {0}]   ;;  %s2075_s5 = inlined_call_operand.vmem [shape: f32[2,8,1], index: 5, kind: output, shape index: {1}]   ;;  %s2076_s6 = inlined_call_operand.vmem [shape: f32[2,8,1], index: 6, kind: output, shape index: {2}]  }
   0x1   :  { %s1722_s23 = smov 0  }
   0x2 LB: > { %s29_s24 = sadd.s32 1, %s1665_s22  ;;  %p1183_p0 = scmp.ge.s32.totalorder %s1669_s23, 1  ;;  %s1669_s23 = sphi %s1722_s23, %s17_s23   ;;  %s1665_s22 = sphi %s1720_s22, %s2078_s22   ;;  %s1661_s21 = sphi %s1718_s21, %s2077_s21  }
   0x3   : > { %p31_p1 = scmp.ge.s32.totalorder %s29_s24, 2  ;;  %p242_p2 = scmp.lt.s32.totalorder %s1669_s23, 3 }
   0x5   : > { %s2080_s24 = smov (%p31_p1, %s29_s24), 0  ;;  %p243_p3 = pnand %p1183_p0, %p242_p2 }
   0x6   : > { %p289_p4 = scmp.lt.s32.totalorder (!%p243_p3), %s1661_s21, 1  ;;  %v1671_v0 = vmov (!%p243_p3), 0.0|0.0   ;;  %s1672_s29 = smov (!%p243_p3), 126   ;;  %v1677_v7 = vmov (!%p243_p3), 0.0   ;;  %vm1680_vm0 = vmmov (!%p243_p3), 0   ;;  %v1681_v8 = vmov (!%p243_p3), 0  }
   0x7   : > { %246 = sbr.rel (%p243_p3) target bundleno = 638 (0x27e), region = 36  ;;  %1415 = vmatprep.subr.bf16.mxu1 (!%p243_p3), %v1671_v0  ;;  %s1673_s30 = smov (!%p243_p3), 127   ;;  %580 = vmatprep.mubr.f32.mxu0 (!%p243_p3), %v1677_v7  ;;  %v506_v9 = vld [vmem:[%s2072_s2] sm:$0xff] (!%p243_p3)  ;;  %vm342_vm1 = vcmask (!%p243_p3), 1039360   ;;  %vm360_vm2 = vcmask (!%p243_p3), 1031168   ;;  %vm378_vm3 = vcmask (!%p243_p3), 900096  }
   0x8   : > { %s1674_s7 = smov (!%p243_p3), 110   ;;  %s1675_s8 = smov (!%p243_p3), 108   ;;  %1326 = vmatprep.mubr.msk.f32.mxu1 (!%p243_p3), %vm1680_vm0, %v1677_v7  ;;  %1646 = vset.pattern.permute.xlu0 (!%p243_p3), %v1681_v8  ;;  %vm396_vm4 = vcmask (!%p243_p3), 891904   ;;  %vm414_vm5 = vcmask (!%p243_p3), 883712   ;;  %vm432_vm6 = vcmask (!%p243_p3), 752640   ;;  %vm450_vm7 = vcmask (!%p243_p3), 744448  }
   0x9   : > { %s1676_s9 = smov (!%p243_p3), 109   ;;  %s1678_s10 = smov (!%p243_p3), 91   ;;  %vm468_vm8 = vcmask (!%p243_p3), 736256   ;;  %vm512_vm9 = vcmask (!%p243_p3), 588800   ;;  %vm1004_vm13 = vcmask (!%p243_p3), 7168  }
   0xa   : > { %s1679_s11 = smov (!%p243_p3), 92   ;;  %s1682_s12 = smov (!%p243_p3), 90  }
   0xe   : > { %s2082_s21 = smov (!%p289_p4, %s1661_s21), 1 }
   0xf   : > { %s1193_s25 = sshll.u32 %s2082_s21, 5  ;;  %s1539_s13 = smul.u32 24, %s2082_s21 }
  0x10   : > { %s293_s28 = scalar_lea.vmem %s2070_s0, %s1193_s25  ;;  %s1187_s17 = sshll.u32 %s2082_s21, 3 }
  0x11   : > { %v324_v1 = vld [vmem:[%s293_s28 + $0x8] sm:$0xff]  ;;  %v1743_v2 = vld [vmem:[%s293_s28 + $0x10] sm:$0xff]  ;;  %v1745_v3 = vld [vmem:[%s293_s28] sm:$0xff]  ;;  %s308_s16 = scalar_lea.vmem %s2074_s4, %s1539_s13  ;;  %s313_s20 = scalar_lea.vmem %s2075_s5, %s1187_s17 }
  0x12   : > { %v1586_v4 = vpack.i.bf16 %v1743_v2, %v324_v1  ;;  %v326_v5 = vld [vmem:[%s293_s28 + $0x18] sm:$0xff]  ;;  %s317_s27 = scalar_lea.vmem %s2076_s6, %s1187_s17 }
  0x13   : > { %v1581_v6 = vpack.i.bf16 %v326_v5, %v1745_v3 }
  0x14   : > { %1587 = vrot.lane.b32.xlu1 %v1586_v4, %s1672_s29  ;;  %1577 = vrot.lane.b32.xlu0 %v1586_v4, %s1673_s30 }
  0x18   : > { %1592 = vrot.lane.b32.xlu1 %v1586_v4, %s1674_s7  ;;  %1582 = vrot.lane.b32.xlu0 %v1581_v6, %s1673_s30 }
  0x1c   : > { %1602 = vrot.lane.b32.xlu1 %v1581_v6, %s1674_s7  ;;  %1597 = vrot.lane.b32.xlu0 %v1581_v6, %s1672_s29 }
  0x20   : > { %1612 = vrot.lane.b32.xlu1 %v1586_v4, %s1675_s8  ;;  %1607 = vrot.lane.b32.xlu0 %v1586_v4, %s1676_s9 }
  0x24   : > { %1622 = vrot.lane.b32.xlu1 %v1581_v6, %s1675_s8  ;;  %1617 = vrot.lane.b32.xlu0 %v1581_v6, %s1676_s9 }
  0x28   : > { %1632 = vrot.lane.b32.xlu1 %v1586_v4, %s1678_s10  ;;  %1627 = vrot.lane.b32.xlu0 %v1586_v4, %s1679_s11 }
  0x2c   : > { %1642 = vrot.lane.b32.xlu1 %v1581_v6, %s1678_s10  ;;  %1637 = vrot.lane.b32.xlu0 %v1581_v6, %s1679_s11 }
  0x30   : > { %464 = vrot.lane.b32.xlu1 %v1743_v2, %s1682_s12  ;;  %462 = vrot.lane.b32.xlu0 %v324_v1, %s1682_s12 }
  0x34   : > { %466 = vrot.lane.b32.xlu1 %v326_v5, %s1682_s12  ;;  %460 = vrot.lane.b32.xlu0 %v1745_v3, %s1682_s12 }
  0x38   : > { %509 = vperm.xlu0 %1646, %v506_v9  }
  0x86   : > { %v1588_v10 = vpop.permute.xlu1 %1587  ;;  %v1578_v11 = vpop.permute.xlu0 %1577 }
  0x87   : > { %v1580_v12 = vunpack.i.h.bf16 %v1578_v11  ;;  %v1579_v13 = vunpack.i.l.bf16 %v1578_v11  ;;  %v1590_v14 = vunpack.i.h.bf16 %v1588_v10  ;;  %v1589_v15 = vunpack.i.l.bf16 %v1588_v10 }
  0x89   : > { %v344_v16 = vsel %vm342_vm1, %v1579_v13, %v1580_v12  ;;  %v362_v26 = vsel %vm360_vm2, %v1589_v15, %v1590_v14 }
  0x8a   : > { %v1593_v17 = vpop.permute.xlu1 %1592  ;;  %v1583_v18 = vpop.permute.xlu0 %1582  ;;  %v1399_v19 = vpack.c.bf16 %v344_v16, %v324_v1 }
  0x8b   : > { %v1595_v20 = vunpack.i.h.bf16 %v1593_v17  ;;  %v1594_v21 = vunpack.i.l.bf16 %v1593_v17  ;;  %v1585_v22 = vunpack.i.h.bf16 %v1583_v18  ;;  %v1584_v23 = vunpack.i.l.bf16 %v1583_v18 }
  0x8c   : > { %1400 = vmatprep.subr.bf16.mxu0 %v1399_v19 }
  0x8d   : > { %v343_v24 = vsel %vm342_vm1, %v1584_v23, %v1579_v13  ;;  %v345_v25 = vsel %vm342_vm1, %v1580_v12, %v1585_v22  ;;  %v380_v27 = vsel %vm378_vm3, %v1594_v21, %v1595_v20 }
  0x8e   : > { %v1603_v28 = vpop.permute.xlu1 %1602  ;;  %v1598_v29 = vpop.permute.xlu0 %1597  ;;  %v1401_v30 = vpack.c.bf16 %v343_v24, %v1745_v3  ;;  %v1416_v31 = vpack.c.bf16 %v345_v25, %v1743_v2  ;;  %v1403_v32 = vpack.c.bf16 %v380_v27, %v362_v26  ;;  %v701_v26 = vld [vmem:[%s2073_s3 + $0x100] sm:$0xff] }
  0x8f   : > { %v1605_v33 = vunpack.i.h.bf16 %v1603_v28  ;;  %v1604_v34 = vunpack.i.l.bf16 %v1603_v28  ;;  %v1600_v35 = vunpack.i.h.bf16 %v1598_v29  ;;  %v1599_v36 = vunpack.i.l.bf16 %v1598_v29  ;;  %v685_v27 = vld [vmem:[%s2073_s3 + $0x80] sm:$0xff]  ;;  %v686_v28 = vld [vmem:[%s2073_s3 + $0x88] sm:$0xff] }
  0x90   : > { %1402 = vmatpush1.bf16.msra.mxu0 %v1401_v30  ;;  %1417 = vmatpush3.bf16.msra.mxu1 %v1416_v31  ;;  %v702_v29 = vld [vmem:[%s2073_s3 + $0x108] sm:$0xff]  ;;  %v669_v30 = vld [vmem:[%s2073_s3] sm:$0xff] }
  0x91   : > { %1404 = vmatprep.subr.bf16.mxu0 %v1403_v32  ;;  %1418 = vmatprep.subr.bf16.mxu1 %v1671_v0  ;;  %v361_v37 = vsel %vm360_vm2, %v1599_v36, %v1589_v15  ;;  %v379_v38 = vsel %vm378_vm3, %v1604_v34, %v1594_v21  ;;  %v363_v39 = vsel %vm360_vm2, %v1590_v14, %v1600_v35  ;;  %v670_v31 = vld [vmem:[%s2073_s3 + $0x8] sm:$0xff]  ;;  %v687_v32 = vld [vmem:[%s2073_s3 + $0x90] sm:$0xff]  ;;  %v478_v36 = vld [vmem:[%s2071_s1] sm:$0xff] }
  0x92   : > { %v1613_v40 = vpop.permute.xlu1 %1612  ;;  %v1608_v41 = vpop.permute.xlu0 %1607  ;;  %v1405_v42 = vpack.c.bf16 %v379_v38, %v361_v37  ;;  %v381_v43 = vsel %vm378_vm3, %v1595_v20, %v1605_v33  ;;  %v688_v33 = vld [vmem:[%s2073_s3 + $0x98] sm:$0xff]  ;;  %v1812_v37 = vpack.c.bf16 %v686_v28, %v685_v27 }
  0x93   : > { %v1615_v44 = vunpack.i.h.bf16 %v1613_v40  ;;  %v1614_v45 = vunpack.i.l.bf16 %v1613_v40  ;;  %v1610_v46 = vunpack.i.h.bf16 %v1608_v41  ;;  %v1609_v47 = vunpack.i.l.bf16 %v1608_v41 }
  0x94   : > { %1406 = vmatpush1.bf16.msra.mxu0 %v1405_v42  ;;  %v1419_v48 = vpack.c.bf16 %v381_v43, %v363_v39  ;;  %v1816_v40 = vpack.c.bf16 %v702_v29, %v701_v26  ;;  %v1818_v41 = vpack.c.bf16 %v670_v31, %v669_v30  ;;  %v703_v42 = vld [vmem:[%s2073_s3 + $0x110] sm:$0xff]  ;;  %v704_v43 = vld [vmem:[%s2073_s3 + $0x118] sm:$0xff]  ;;  %v714_v26 = vld [vmem:[%s2073_s3 + $0x168] sm:$0xff] }
  0x95   : > { %v398_v49 = vsel %vm396_vm4, %v1609_v47, %v1610_v46  ;;  %v416_v50 = vsel %vm414_vm5, %v1614_v45, %v1615_v44  ;;  %v681_v29 = vld [vmem:[%s2073_s3 + $0x60] sm:$0xff]  ;;  %v682_v30 = vld [vmem:[%s2073_s3 + $0x68] sm:$0xff] }
  0x96   : > { %1420 = vmatpush3.bf16.msra.mxu1 %v1419_v48  ;;  %v1623_v51 = vpop.permute.xlu1 %1622  ;;  %v1618_v52 = vpop.permute.xlu0 %1617  ;;  %v1407_v53 = vpack.c.bf16 %v416_v50, %v398_v49  ;;  %v690_v48 = vld [vmem:[%s2073_s3 + $0xa8] sm:$0xff]  ;;  %v1844_v49 = vpack.c.bf16 %v704_v43, %v703_v42  ;;  %v1986_v31 = vpack.c.bf16 %v682_v30, %v681_v29  ;;  %v684_v42 = vld [vmem:[%s2073_s3 + $0x78] sm:$0xff] }
  0x97   : > { %v1625_v54 = vunpack.i.h.bf16 %v1623_v51  ;;  %v1624_v55 = vunpack.i.l.bf16 %v1623_v51  ;;  %v1620_v56 = vunpack.i.h.bf16 %v1618_v52  ;;  %v1619_v57 = vunpack.i.l.bf16 %v1618_v52  ;;  %1421 = vmatprep.subr.bf16.mxu1 %v1671_v0  ;;  %v705_v51 = vld [vmem:[%s2073_s3 + $0x120] sm:$0xff]  ;;  %v706_v52 = vld [vmem:[%s2073_s3 + $0x128] sm:$0xff] }
  0x98   : > { %1408 = vmatprep.subr.bf16.mxu0 %v1407_v53 }
  0x99   : > { %v397_v58 = vsel %vm396_vm4, %v1619_v57, %v1609_v47  ;;  %v415_v59 = vsel %vm414_vm5, %v1624_v55, %v1614_v45  ;;  %v399_v60 = vsel %vm396_vm4, %v1610_v46, %v1620_v56  ;;  %v417_v61 = vsel %vm414_vm5, %v1615_v44, %v1625_v54  ;;  %v671_v45 = vld [vmem:[%s2073_s3 + $0x10] sm:$0xff]  ;;  %v672_v46 = vld [vmem:[%s2073_s3 + $0x18] sm:$0xff]  ;;  %v689_v47 = vld [vmem:[%s2073_s3 + $0xa0] sm:$0xff] }
  0x9a   : > { %v1633_v62 = vpop.permute.xlu1 %1632  ;;  %v1628_v63 = vpop.permute.xlu0 %1627  ;;  %v1409_v1 = vpack.c.bf16 %v415_v59, %v397_v58  ;;  %v1422_v2 = vpack.c.bf16 %v417_v61, %v399_v60  ;;  %v1826_v44 = vpack.c.bf16 %v688_v33, %v687_v32  ;;  %v1846_v50 = vpack.c.bf16 %v672_v46, %v671_v45  ;;  %v673_v54 = vld [vmem:[%s2073_s3 + $0x20] sm:$0xff]  ;;  %v674_v55 = vld [vmem:[%s2073_s3 + $0x28] sm:$0xff]  ;;  %v691_v56 = vld [vmem:[%s2073_s3 + $0xb0] sm:$0xff] }
  0x9b   : > { %v1635_v3 = vunpack.i.h.bf16 %v1633_v62  ;;  %v1634_v4 = vunpack.i.l.bf16 %v1633_v62  ;;  %v1630_v5 = vunpack.i.h.bf16 %v1628_v63  ;;  %v1629_v6 = vunpack.i.l.bf16 %v1628_v63  ;;  %v692_v57 = vld [vmem:[%s2073_s3 + $0xb8] sm:$0xff]  ;;  %v707_v60 = vld [vmem:[%s2073_s3 + $0x130] sm:$0xff] }
  0x9c   : > { %1410 = vmatpush1.bf16.msra.mxu0 %v1409_v1  ;;  %1423 = vmatpush3.bf16.msra.mxu1 %v1422_v2  ;;  %v1856_v53 = vpack.c.bf16 %v690_v48, %v689_v47  ;;  %v1874_v58 = vpack.c.bf16 %v706_v52, %v705_v51  ;;  %v1876_v59 = vpack.c.bf16 %v674_v55, %v673_v54  ;;  %v708_v61 = vld [vmem:[%s2073_s3 + $0x138] sm:$0xff]  ;;  %v675_v63 = vld [vmem:[%s2073_s3 + $0x30] sm:$0xff]  ;;  %v693_v2 = vld [vmem:[%s2073_s3 + $0xc0] sm:$0xff] }
  0x9d   : > { %v434_v8 = vsel %vm432_vm6, %v1629_v6, %v1630_v5  ;;  %v452_v9 = vsel %vm450_vm7, %v1634_v4, %v1635_v3  ;;  %1424 = vmatprep.subr.bf16.mxu1 %v1671_v0  ;;  %v1886_v62 = vpack.c.bf16 %v692_v57, %v691_v56  ;;  %v676_v1 = vld [vmem:[%s2073_s3 + $0x38] sm:$0xff]  ;;  %v715_v32 = vld [vmem:[%s2073_s3 + $0x170] sm:$0xff] }
  0x9e   : > { %v1643_v10 = vpop.permute.xlu1 %1642  ;;  %v1638_v11 = vpop.permute.xlu0 %1637  ;;  %v1411_v12 = vpack.c.bf16 %v452_v9, %v434_v8  ;;  %v710_v8 = vld [vmem:[%s2073_s3 + $0x148] sm:$0xff]  ;;  %v716_v33 = vld [vmem:[%s2073_s3 + $0x178] sm:$0xff] }
  0x9f   : > { %v1645_v13 = vunpack.i.h.bf16 %v1643_v10  ;;  %v1644_v14 = vunpack.i.l.bf16 %v1643_v10  ;;  %v1640_v15 = vunpack.i.h.bf16 %v1638_v11  ;;  %v1639_v16 = vunpack.i.l.bf16 %v1638_v11  ;;  %v677_v10 = vld [vmem:[%s2073_s3 + $0x40] sm:$0xff]  ;;  %v678_v11 = vld [vmem:[%s2073_s3 + $0x48] sm:$0xff] }
  0xa0   : > { %1412 = vmatprep.subr.bf16.mxu0 %v1411_v12  ;;  %v695_v12 = vld [vmem:[%s2073_s3 + $0xd0] sm:$0xff] }
  0xa1   : > { %v433_v17 = vsel %vm432_vm6, %v1639_v16, %v1629_v6  ;;  %v451_v18 = vsel %vm450_vm7, %v1644_v14, %v1634_v4  ;;  %v435_v19 = vsel %vm432_vm6, %v1630_v5, %v1640_v15  ;;  %v453_v20 = vsel %vm450_vm7, %v1635_v3, %v1645_v13  ;;  %v694_v3 = vld [vmem:[%s2073_s3 + $0xc8] sm:$0xff]  ;;  %v709_v6 = vld [vmem:[%s2073_s3 + $0x140] sm:$0xff]  ;;  %v696_v13 = vld [vmem:[%s2073_s3 + $0xd8] sm:$0xff] }
  0xa2   : > { %v465_v21 = vpop.permute.xlu1 %464  ;;  %v463_v22 = vpop.permute.xlu0 %462  ;;  %v1413_v23 = vpack.c.bf16 %v451_v18, %v433_v17  ;;  %v1425_v24 = vpack.c.bf16 %v453_v20, %v435_v19  ;;  %v1902_v4 = vpack.c.bf16 %v708_v61, %v707_v60  ;;  %v1904_v5 = vpack.c.bf16 %v676_v1, %v675_v63  ;;  %v711_v16 = vld [vmem:[%s2073_s3 + $0x150] sm:$0xff]  ;;  %v712_v17 = vld [vmem:[%s2073_s3 + $0x158] sm:$0xff] }
  0xa3   : > { %v470_v25 = vsel %vm468_vm8, %v463_v22, %v465_v21  ;;  %v1914_v9 = vpack.c.bf16 %v694_v3, %v693_v2  ;;  %v1930_v14 = vpack.c.bf16 %v710_v8, %v709_v6  ;;  %v1932_v15 = vpack.c.bf16 %v678_v11, %v677_v10  ;;  %v679_v19 = vld [vmem:[%s2073_s3 + $0x50] sm:$0xff]  ;;  %v680_v20 = vld [vmem:[%s2073_s3 + $0x58] sm:$0xff] }
  0xa4   : > { %1414 = vmatpush1.bf16.msra.mxu0 %v1413_v23  ;;  %1426 = vmatpush3.bf16.msra.mxu1 %v1425_v24  ;;  %v1942_v18 = vpack.c.bf16 %v696_v13, %v695_v12  ;;  %v1958_v23 = vpack.c.bf16 %v712_v17, %v711_v16  ;;  %v1960_v24 = vpack.c.bf16 %v680_v20, %v679_v19 }
  0xa5   : > { %532 = vmatprep.subr.mxu0 %v470_v25  ;;  %1324 = vmatprep.subr.mxu1 %v1677_v7  ;;  %v713_v25 = vld [vmem:[%s2073_s3 + $0x160] sm:$0xff] }
  0xa6   : > { %v467_v34 = vpop.permute.xlu1 %466  ;;  %v461_v35 = vpop.permute.xlu0 %460  ;;  %v1974_v28 = vpack.c.bf16 %v714_v26, %v713_v25 }
  0xa7   : > { %v469_v38 = vsel %vm468_vm8, %v461_v35, %v463_v22  ;;  %v471_v39 = vsel %vm468_vm8, %v465_v21, %v467_v34  ;;  %v697_v21 = vld [vmem:[%s2073_s3 + $0xe0] sm:$0xff]  ;;  %v698_v22 = vld [vmem:[%s2073_s3 + $0xe8] sm:$0xff]  ;;  %v1995_v34 = vpack.c.bf16 %v716_v33, %v715_v32  ;;  %v699_v35 = vld [vmem:[%s2073_s3 + $0xf0] sm:$0xff] }
  0xa8   : > { %533 = vmatpush1.msra.mxu0 %v469_v38  ;;  %1325 = vmatpush3.msra.mxu1 %v471_v39  ;;  %v1970_v27 = vpack.c.bf16 %v698_v22, %v697_v21  ;;  %v683_v39 = vld [vmem:[%s2073_s3 + $0x70] sm:$0xff] }
  0xa9   : > { %1189 = vmatmul.mubr.msk.f32.vlgmr.msra.gmra.mrb[0].mxu0 %vm512_vm9, %v478_v36  ;;  %1327 = vmatmul.mubr.msk.f32.vlgmr.msra.gmra.mrb[0].mxu1 %vm512_vm9, %v478_v36  ;;  %v700_v36 = vld [vmem:[%s2073_s3 + $0xf8] sm:$0xff]  ;;  %v2012_v43 = vpack.c.bf16 %v684_v42, %v683_v39 }
  0xaa   : > { %1459 = vmatprep.subr.bf16.mxu1 %v1671_v0  ;;  %1428 = vmatprep.subr.bf16.mxu0 %v1812_v37  ;;  %v2003_v38 = vpack.c.bf16 %v700_v36, %v699_v35 }
  0xab   : > { %1461 = vmatpush3.bf16.msra.mxu1 %v1816_v40  ;;  %1430 = vmatpush3.bf16.msra.mxu0 %v1818_v41 }
  0xac   : > { %1462 = vmatprep.subr.bf16.mxu1 %v1671_v0  ;;  %1432 = vmatprep.subr.bf16.mxu0 %v1826_v44 }
  0xad   : > { %1361 = vmatprep.mubr.msk.f32.mxu1 %vm1680_vm0, %v1677_v7 }
  0xaf   : > { %1464 = vmatpush3.bf16.msra.mxu1 %v1844_v49  ;;  %1434 = vmatpush3.bf16.msra.mxu0 %v1846_v50 }
  0xb0   : > { %1465 = vmatprep.subr.bf16.mxu1 %v1671_v0  ;;  %1436 = vmatprep.subr.bf16.mxu0 %v1856_v53 }
  0xb3   : > { %1467 = vmatpush3.bf16.msra.mxu1 %v1874_v58  ;;  %1438 = vmatpush3.bf16.msra.mxu0 %v1876_v59 }
  0xb4   : > { %1468 = vmatprep.subr.bf16.mxu1 %v1671_v0  ;;  %1440 = vmatprep.subr.bf16.mxu0 %v1886_v62 }
  0xb7   : > { %1470 = vmatpush3.bf16.msra.mxu1 %v1902_v4  ;;  %1442 = vmatpush3.bf16.msra.mxu0 %v1904_v5  ;;  %v510_v45 = vpop.permute.xlu0 %509 }
  0xb8   : > { %1471 = vmatprep.subr.bf16.mxu1 %v1671_v0  ;;  %1444 = vmatprep.subr.bf16.mxu0 %v1914_v9 }
  0xbb   : > { %1473 = vmatpush3.bf16.msra.mxu1 %v1930_v14  ;;  %1446 = vmatpush3.bf16.msra.mxu0 %v1932_v15 }
  0xbc   : > { %1474 = vmatprep.subr.bf16.mxu1 %v1671_v0  ;;  %1448 = vmatprep.subr.bf16.mxu0 %v1942_v18 }
  0xbf   : > { %1476 = vmatpush3.bf16.msra.mxu1 %v1958_v23  ;;  %1450 = vmatpush3.bf16.msra.mxu0 %v1960_v24 }
  0xc0   : > { %1477 = vmatprep.subr.bf16.mxu1 %v1671_v0  ;;  %1452 = vmatprep.subr.bf16.mxu0 %v1970_v27 }
  0xc3   : > { %1479 = vmatpush3.bf16.msra.mxu1 %v1974_v28  ;;  %1454 = vmatpush3.bf16.msra.mxu0 %v1986_v31 }
  0xc4   : > { %1480 = vmatprep.subr.bf16.mxu1 %v1671_v0  ;;  %1456 = vmatprep.subr.bf16.mxu0 %v2003_v38 }
  0xc7   : > { %1482 = vmatpush3.bf16.msra.mxu1 %v1995_v34  ;;  %1458 = vmatpush3.bf16.msra.mxu0 %v2012_v43 }
  0xc8   : > { %1515 = vmatprep.subr.bf16.mxu1 %v1671_v0  ;;  %1484 = vmatprep.subr.bf16.mxu0 %v1812_v37 }
 0x17c   : > { %v582_v46 = vpop.f32.mrb[0].mxu0  ;;  %v653_v47 = vpop.f32.mrb[0].mxu1 }
 0x17d   : > { %v583_v48 = vadd.f32 %v582_v46, %v510_v45  ;;  %v654_v51 = vadd.f32 %v653_v47, %v510_v45  ;;  %v584_v52 = vpop.f32.mrb[1].mxu0  ;;  %v1328_v54 = vpop.f32.mrb[1].mxu1 }
 0x17e   : > { %v585_v55 = vadd.f32 %v584_v52, %v510_v45 }
 0x17f   : > { %vm657_vm10 = vcmp.ge.f32.partialorder %v583_v48, 0.0  ;;  %v660_v56 = vmul.f32 0.01, %v583_v48  ;;  %vm659_vm11 = vcmp.ge.f32.partialorder %v654_v51, 0.0  ;;  %v662_v57 = vmul.f32 0.01, %v654_v51 }
 0x180   : > { %v661_v60 = vmul.f32 0.01, %v585_v55  ;;  %vm658_vm12 = vcmp.ge.f32.partialorder %v585_v55, 0.0 }
 0x181   : > { %v665_v37 = vsel %vm659_vm11, %v654_v51, %v662_v57  ;;  %v663_v61 = vsel %vm657_vm10, %v583_v48, %v660_v56 }
 0x182   : > { %668 = vst [vmem:[%s308_s16 + $0x10] sm:$0xff] %v665_v37  ;;  %1362 = vmatmul.mubr.f32.vlgmr.msra.gmra.mrb[2].mxu1 %v665_v37  ;;  %v664_v63 = vsel %vm658_vm12, %v585_v55, %v661_v60  ;;  %666 = vst [vmem:[%s308_s16] sm:$0xff] %v663_v61 }
 0x183   : > { %1517 = vmatpush3.bf16.msra.mxu1 %v1816_v40  ;;  %667 = vst [vmem:[%s308_s16 + $0x8] sm:$0xff] %v664_v63  ;;  %781 = vmatprep.mubr.f32.mxu0 %v664_v63  ;;  %v858_v1 = vmul.f32 %v664_v63, %v664_v63  ;;  %v857_v40 = vmul.f32 %v663_v61, %v663_v61 }
 0x184   : > { %782 = vmatmul.mubr.f32.vlgmr.msra.gmra.mrb[2].mxu0 %v663_v61  ;;  %1518 = vmatprep.subr.bf16.mxu1 %v1671_v0 }
 0x185   : > { %1486 = vmatpush3.bf16.msra.mxu0 %v1818_v41  ;;  %924 = vmatprep.mubr.f32.mxu0 %v858_v1 }
 0x186   : > { %1488 = vmatprep.subr.bf16.mxu0 %v1826_v44  ;;  %1396 = vmatprep.mubr.msk.f32.mxu1 %vm1680_vm0, %v1677_v7  ;;  %v859_v7 = vmul.f32 %v665_v37, %v665_v37 }
 0x187   : > { %1520 = vmatpush3.bf16.msra.mxu1 %v1844_v49 }
 0x188   : > { %1521 = vmatprep.subr.bf16.mxu1 %v1671_v0 }
 0x189   : > { %1490 = vmatpush3.bf16.msra.mxu0 %v1846_v50 }
 0x18a   : > { %1492 = vmatprep.subr.bf16.mxu0 %v1856_v53 }
 0x18b   : > { %1523 = vmatpush3.bf16.msra.mxu1 %v1874_v58 }
 0x18c   : > { %1524 = vmatprep.subr.bf16.mxu1 %v1671_v0 }
 0x18d   : > { %1494 = vmatpush3.bf16.msra.mxu0 %v1876_v59 }
 0x18e   : > { %1496 = vmatprep.subr.bf16.mxu0 %v1886_v62 }
 0x18f   : > { %1526 = vmatpush3.bf16.msra.mxu1 %v1902_v4 }
 0x190   : > { %1527 = vmatprep.subr.bf16.mxu1 %v1671_v0 }
 0x191   : > { %1498 = vmatpush3.bf16.msra.mxu0 %v1904_v5 }
 0x192   : > { %1500 = vmatprep.subr.bf16.mxu0 %v1914_v9 }
 0x193   : > { %1529 = vmatpush3.bf16.msra.mxu1 %v1930_v14 }
 0x194   : > { %1530 = vmatprep.subr.bf16.mxu1 %v1671_v0 }
 0x195   : > { %1502 = vmatpush3.bf16.msra.mxu0 %v1932_v15 }
 0x196   : > { %1504 = vmatprep.subr.bf16.mxu0 %v1942_v18 }
 0x197   : > { %1532 = vmatpush3.bf16.msra.mxu1 %v1958_v23 }
 0x198   : > { %1533 = vmatprep.subr.bf16.mxu1 %v1671_v0 }
 0x199   : > { %1506 = vmatpush3.bf16.msra.mxu0 %v1960_v24 }
 0x19a   : > { %1508 = vmatprep.subr.bf16.mxu0 %v1970_v27 }
 0x19b   : > { %1535 = vmatpush3.bf16.msra.mxu1 %v1974_v28 }
 0x19c   : > { %1536 = vmatprep.subr.bf16.mxu1 %v1671_v0 }
 0x19d   : > { %1510 = vmatpush3.bf16.msra.mxu0 %v1986_v31 }
 0x19e   : > { %1512 = vmatprep.subr.bf16.mxu0 %v2003_v38 }
 0x19f   : > { %1538 = vmatpush3.bf16.msra.mxu1 %v1995_v34 }
 0x1a1   : > { %1514 = vmatpush3.bf16.msra.mxu0 %v2012_v43 }
 0x1a2   : > { %1397 = vmatmul.mubr.f32.vlgmr.msra.gmra.mrb[4].mxu1 %v859_v7 }
 0x1a4   : > { %925 = vmatmul.mubr.f32.vlgmr.msra.gmra.mrb[4].mxu0 %v857_v40 }
 0x255   : > { %v853_v41 = vpop.f32.mrb[2].mxu1 }
 0x256   : > { %v1363_v44 = vpop.f32.mrb[3].mxu1 }
 0x257   : > { %v1236_v49 = vpop.f32.mrb[2].mxu0 }
 0x258   : > { %v1237_v50 = vpop.f32.mrb[3].mxu0 }
 0x259   : > { %v1238_v53 = vadd.f32 %v1237_v50, %v1236_v49 }
 0x25b   : > { %v854_v0 = vadd.f32 %v1238_v53, %v853_v41 }
 0x25d   : > { %1005 = vst.msk [vmem:[%s313_s20] sm:$0xff] %vm1004_vm13, %v854_v0 }
 0x275   : > { %v996_v58 = vpop.f32.mrb[4].mxu1 }
 0x276   : > { %v1398_v59 = vpop.f32.mrb[5].mxu1 }
 0x277   : > { %v1288_v62 = vpop.f32.mrb[4].mxu0 }
 0x278   : > { %v1289_v2 = vpop.f32.mrb[5].mxu0 }
 0x279   : > { %v1290_v3 = vadd.f32 %v1289_v2, %v1288_v62 }
 0x27b   : > { %v997_v4 = vadd.f32 %v1290_v3, %v996_v58 }
 0x27d   : > { %1006 = vst.msk [vmem:[%s317_s27] sm:$0xff] %vm1004_vm13, %v997_v4 }
 0x27e PF: > { %s17_s23 = sadd.s32 1, %s1669_s23   ;;  %s2077_s21 = smov %s1665_s22 }
 0x27f   : > { %p14_p5 = scmp.ge.s32.totalorder %s17_s23, 4   ;;  %s2078_s22 = smov %s2080_s24 }
 0x281   :  { %16 = sbr.rel (!%p14_p5) target bundleno = 2 (0x2), region = 102 }

// kernel: encoder_forward.6
= control target key start
LH: loop header
LB: loop body
LE: loop exit
PB: predicated region body
PF: predicated region fallthrough
CT: control target
= control target key end

     0   :  { %s1806_s27 = smov 0   ;;  %s1808_s28 = smov 0   ;;  %s2156_s0 = inlined_call_operand.vmem [shape: f32[2,8,512], index: 0, kind: input, shape index: {}]   ;;  %s2157_s1 = inlined_call_operand.vmem [shape: f32[8,72], index: 1, kind: input, shape index: {}]   ;;  %s2158_s2 = inlined_call_operand.vmem [shape: f32[8,1], index: 2, kind: input, shape index: {}]   ;;  %s2159_s3 = inlined_call_operand.vmem [shape: f32[8,1], index: 3, kind: input, shape index: {}]   ;;  %s2160_s4 = inlined_call_operand.vmem [shape: f32[8,1], index: 4, kind: input, shape index: {}]   ;;  %s2161_s5 = inlined_call_operand.vmem [shape: f32[384,1], index: 5, kind: input, shape index: {}]   ;;  %s2162_s6 = inlined_call_operand.vmem [shape: f32[2,8,384], index: 6, kind: output, shape index: {0}]   ;;  %s2163_s7 = inlined_call_operand.vmem [shape: f32[2,8,1], index: 7, kind: output, shape index: {1}]   ;;  %s2164_s8 = inlined_call_operand.vmem [shape: f32[2,8,1], index: 8, kind: output, shape index: {2}]  }
   0x1   :  { %s1810_s29 = smov 0  }
   0x2 LB: > { %s31_s30 = sadd.s32 1, %s1743_s28  ;;  %p1261_p0 = scmp.ge.s32.totalorder %s1747_s29, 1  ;;  %s1747_s29 = sphi %s1810_s29, %s19_s29   ;;  %s1743_s28 = sphi %s1808_s28, %s2166_s28   ;;  %s1739_s27 = sphi %s1806_s27, %s2165_s27  }
   0x3   : > { %p33_p1 = scmp.ge.s32.totalorder %s31_s30, 2  ;;  %p292_p2 = scmp.lt.s32.totalorder %s1747_s29, 3 }
   0x5   : > { %s2168_s30 = smov (%p33_p1, %s31_s30), 0  ;;  %p293_p3 = pnand %p1261_p0, %p292_p2 }
   0x6   : > { %v381_v0 = vld [vmem:[%s2159_s3] sm:$0xff] (!%p293_p3)  ;;  %v1749_v1 = vmov (!%p293_p3), 0   ;;  %p343_p4 = scmp.lt.s32.totalorder (!%p293_p3), %s1739_s27, 1  ;;  %v1750_v19 = vmov (!%p293_p3), 0.0|0.0   ;;  %s1751_s17 = smov (!%p293_p3), 126   ;;  %v1757_v24 = vmov (!%p293_p3), 0.0  }
   0x7   : > { %296 = sbr.rel (%p293_p3) target bundleno = 768 (0x300), region = 44  ;;  %1654 = vset.pattern.permute.xlu0 (!%p293_p3), %v1749_v1  ;;  %v391_v2 = vld [vmem:[%s2160_s4] sm:$0xff] (!%p293_p3)  ;;  %1493 = vmatprep.subr.bf16.mxu1 (!%p293_p3), %v1750_v19  ;;  %s1752_s18 = smov (!%p293_p3), 127   ;;  %vm1760_vm0 = vmmov (!%p293_p3), 0   ;;  %vm420_vm1 = vcmask (!%p293_p3), 1039360   ;;  %vm438_vm2 = vcmask (!%p293_p3), 1031168  }
   0x8   : > { %384 = vperm.xlu0 (!%p293_p3), %1654, %v381_v0   ;;  %s1753_s19 = smov (!%p293_p3), 109   ;;  %s1754_s20 = smov (!%p293_p3), 110   ;;  %658 = vmatprep.mubr.f32.mxu0 (!%p293_p3), %v1757_v24  ;;  %v584_v25 = vld [vmem:[%s2158_s2] sm:$0xff] (!%p293_p3)  ;;  %vm456_vm3 = vcmask (!%p293_p3), 900096   ;;  %vm474_vm4 = vcmask (!%p293_p3), 891904   ;;  %vm492_vm5 = vcmask (!%p293_p3), 883712  }
   0x9   : > { %s1755_s21 = smov (!%p293_p3), 92   ;;  %s1756_s22 = smov (!%p293_p3), 108   ;;  %1404 = vmatprep.mubr.msk.f32.mxu1 (!%p293_p3), %vm1760_vm0, %v1757_v24  ;;  %vm510_vm6 = vcmask (!%p293_p3), 752640   ;;  %vm528_vm7 = vcmask (!%p293_p3), 744448   ;;  %vm546_vm8 = vcmask (!%p293_p3), 736256   ;;  %vm590_vm9 = vcmask (!%p293_p3), 588800  }
   0xa   : > { %s1758_s23 = smov (!%p293_p3), 90   ;;  %s1759_s24 = smov (!%p293_p3), 91   ;;  %vm1082_vm13 = vcmask (!%p293_p3), 7168  }
   0xc   : > { %394 = vperm.xlu0 (!%p293_p3), %1654, %v391_v2  }
   0xe   : > { %s2170_s27 = smov (!%p343_p4, %s1739_s27), 1 }
   0xf   : > { %s1271_s13 = sshll.u32 %s2170_s27, 5 }
  0x10   : > { %s347_s16 = scalar_lea.vmem %s2156_s0, %s1271_s13 }
  0x11   : > { %v377_v3 = vld [vmem:[%s347_s16] sm:$0xff]  ;;  %v378_v5 = vld [vmem:[%s347_s16 + $0x8] sm:$0xff]  ;;  %v379_v6 = vld [vmem:[%s347_s16 + $0x10] sm:$0xff] }
  0x12   : > { %v380_v7 = vld [vmem:[%s347_s16 + $0x18] sm:$0xff] }
  0x87   : > { %v385_v4 = vpop.permute.xlu0 %384 }
  0x88   : > { %v387_v8 = vmul.f32 %v385_v4, %v377_v3  ;;  %v388_v9 = vmul.f32 %v385_v4, %v378_v5  ;;  %v389_v10 = vmul.f32 %v385_v4, %v379_v6  ;;  %v390_v11 = vmul.f32 %v385_v4, %v380_v7 }
  0x8b   : > { %v395_v12 = vpop.permute.xlu0 %394 }
  0x8c   : > { %v397_v13 = vadd.f32 %v395_v12, %v387_v8  ;;  %v398_v14 = vadd.f32 %v395_v12, %v388_v9  ;;  %v399_v15 = vadd.f32 %v395_v12, %v389_v10  ;;  %v400_v16 = vadd.f32 %v395_v12, %v390_v11 }
  0x8e   : > { %v402_v17 = vmax.f32 %v398_v14, 0.0  ;;  %v1836_v18 = vmax.f32 %v399_v15, 0.0  ;;  %v401_v20 = vmax.f32 %v397_v13, 0.0  ;;  %v404_v21 = vmax.f32 %v400_v16, 0.0 }
  0x90   : > { %v1665_v22 = vpack.i.bf16 %v1836_v18, %v402_v17  ;;  %v1675_v23 = vpack.i.bf16 %v404_v21, %v401_v20 }
  0x92   : > { %1666 = vrot.lane.b32.xlu0 %v1665_v22, %s1751_s17  ;;  %1656 = vrot.lane.b32.xlu1 %v1665_v22, %s1752_s18 }
  0x96   : > { %1676 = vrot.lane.b32.xlu0 %v1675_v23, %s1751_s17  ;;  %1661 = vrot.lane.b32.xlu1 %v1675_v23, %s1752_s18  ;;  %s1617_s17 = smul.u32 24, %s2170_s27 }
  0x9a   : > { %1686 = vrot.lane.b32.xlu0 %v1665_v22, %s1753_s19  ;;  %1671 = vrot.lane.b32.xlu1 %v1665_v22, %s1754_s20 }
  0x9e   : > { %1696 = vrot.lane.b32.xlu0 %v1675_v23, %s1753_s19  ;;  %1681 = vrot.lane.b32.xlu1 %v1675_v23, %s1754_s20  ;;  %s362_s20 = scalar_lea.vmem %s2162_s6, %s1617_s17 }
  0xa2   : > { %1706 = vrot.lane.b32.xlu0 %v1665_v22, %s1755_s21  ;;  %1691 = vrot.lane.b32.xlu1 %v1665_v22, %s1756_s22 }
  0xa6   : > { %1716 = vrot.lane.b32.xlu0 %v1675_v23, %s1755_s21  ;;  %1701 = vrot.lane.b32.xlu1 %v1675_v23, %s1756_s22  ;;  %s1265_s21 = sshll.u32 %s2170_s27, 3 }
  0xa7   : > { %s371_s9 = scalar_lea.vmem %s2164_s8, %s1265_s21 }
  0xaa   : > { %540 = vrot.lane.b32.xlu0 %v402_v17, %s1758_s23  ;;  %1711 = vrot.lane.b32.xlu1 %v1665_v22, %s1759_s24 }
  0xae   : > { %538 = vrot.lane.b32.xlu0 %v401_v20, %s1758_s23  ;;  %1721 = vrot.lane.b32.xlu1 %v1675_v23, %s1759_s24  ;;  %s367_s24 = scalar_lea.vmem %s2163_s7, %s1265_s21 }
  0xb2   : > { %587 = vperm.xlu0 %1654, %v584_v25   ;;  %542 = vrot.lane.b32.xlu1 %v1836_v18, %s1758_s23 }
  0xb6   : > { %544 = vrot.lane.b32.xlu1 %v404_v21, %s1758_s23 }
 0x104   : > { %v1667_v26 = vpop.permute.xlu0 %1666  ;;  %v1657_v27 = vpop.permute.xlu1 %1656 }
 0x105   : > { %v1659_v28 = vunpack.i.h.bf16 %v1657_v27  ;;  %v1658_v29 = vunpack.i.l.bf16 %v1657_v27  ;;  %v1669_v36 = vunpack.i.h.bf16 %v1667_v26  ;;  %v1668_v37 = vunpack.i.l.bf16 %v1667_v26 }
 0x107   : > { %v422_v30 = vsel %vm420_vm1, %v1658_v29, %v1659_v28  ;;  %v440_v48 = vsel %vm438_vm2, %v1668_v37, %v1669_v36 }
 0x108   : > { %v1677_v31 = vpop.permute.xlu0 %1676  ;;  %v1662_v32 = vpop.permute.xlu1 %1661  ;;  %v1477_v33 = vpack.c.bf16 %v422_v30, %v402_v17 }
 0x109   : > { %v1664_v34 = vunpack.i.h.bf16 %v1662_v32  ;;  %v1663_v35 = vunpack.i.l.bf16 %v1662_v32  ;;  %v1679_v46 = vunpack.i.h.bf16 %v1677_v31  ;;  %v1678_v47 = vunpack.i.l.bf16 %v1677_v31 }
 0x10a   : > { %1478 = vmatprep.subr.bf16.mxu0 %v1477_v33 }
 0x10b   : > { %v421_v38 = vsel %vm420_vm1, %v1663_v35, %v1658_v29  ;;  %v423_v39 = vsel %vm420_vm1, %v1659_v28, %v1664_v34  ;;  %v439_v55 = vsel %vm438_vm2, %v1678_v47, %v1668_v37  ;;  %v441_v56 = vsel %vm438_vm2, %v1669_v36, %v1679_v46  ;;  %v780_v46 = vld [vmem:[%s2161_s5 + $0x108] sm:$0xff]  ;;  %v747_v47 = vld [vmem:[%s2161_s5] sm:$0xff] }
 0x10c   : > { %v1687_v40 = vpop.permute.xlu0 %1686  ;;  %v1672_v41 = vpop.permute.xlu1 %1671  ;;  %v1479_v42 = vpack.c.bf16 %v421_v38, %v401_v20  ;;  %v1494_v43 = vpack.c.bf16 %v423_v39, %v1836_v18 }
 0x10d   : > { %v1674_v44 = vunpack.i.h.bf16 %v1672_v41  ;;  %v1673_v45 = vunpack.i.l.bf16 %v1672_v41  ;;  %v1689_v57 = vunpack.i.h.bf16 %v1687_v40  ;;  %v1688_v58 = vunpack.i.l.bf16 %v1687_v40 }
 0x10e   : > { %1480 = vmatpush1.bf16.msra.mxu0 %v1479_v42  ;;  %1495 = vmatpush3.bf16.msra.mxu1 %v1494_v43  ;;  %v779_v42 = vld [vmem:[%s2161_s5 + $0x100] sm:$0xff] }
 0x10f   : > { %v458_v49 = vsel %vm456_vm3, %v1673_v45, %v1674_v44  ;;  %1496 = vmatprep.subr.bf16.mxu1 %v1750_v19  ;;  %v476_v5 = vsel %vm474_vm4, %v1688_v58, %v1689_v57  ;;  %v763_v43 = vld [vmem:[%s2161_s5 + $0x80] sm:$0xff] }
 0x110   : > { %v1697_v50 = vpop.permute.xlu0 %1696  ;;  %v1682_v51 = vpop.permute.xlu1 %1681  ;;  %v1481_v52 = vpack.c.bf16 %v458_v49, %v440_v48  ;;  %v748_v48 = vld [vmem:[%s2161_s5 + $0x8] sm:$0xff]  ;;  %v765_v49 = vld [vmem:[%s2161_s5 + $0x90] sm:$0xff] }
 0x111   : > { %v1684_v53 = vunpack.i.h.bf16 %v1682_v51  ;;  %v1683_v54 = vunpack.i.l.bf16 %v1682_v51  ;;  %v1699_v3 = vunpack.i.h.bf16 %v1697_v50  ;;  %v1698_v4 = vunpack.i.l.bf16 %v1697_v50  ;;  %v766_v50 = vld [vmem:[%s2161_s5 + $0x98] sm:$0xff] }
 0x112   : > { %1482 = vmatprep.subr.bf16.mxu0 %v1481_v52  ;;  %v556_v52 = vld [vmem:[%s2157_s1] sm:$0xff] }
 0x113   : > { %v457_v59 = vsel %vm456_vm3, %v1683_v54, %v1673_v45  ;;  %v459_v60 = vsel %vm456_vm3, %v1674_v44, %v1684_v53  ;;  %v475_v12 = vsel %vm474_vm4, %v1698_v4, %v1688_v58  ;;  %v477_v13 = vsel %vm474_vm4, %v1689_v57, %v1699_v3  ;;  %v764_v44 = vld [vmem:[%s2161_s5 + $0x88] sm:$0xff]  ;;  %v781_v58 = vld [vmem:[%s2161_s5 + $0x110] sm:$0xff]  ;;  %v783_v3 = vld [vmem:[%s2161_s5 + $0x120] sm:$0xff] }
 0x114   : > { %v1707_v61 = vpop.permute.xlu0 %1706  ;;  %v1692_v62 = vpop.permute.xlu1 %1691  ;;  %v1483_v63 = vpack.c.bf16 %v457_v59, %v439_v55  ;;  %v1497_v0 = vpack.c.bf16 %v459_v60, %v441_v56  ;;  %v1898_v53 = vpack.c.bf16 %v764_v44, %v763_v43  ;;  %v1902_v56 = vpack.c.bf16 %v780_v46, %v779_v42  ;;  %v782_v59 = vld [vmem:[%s2161_s5 + $0x118] sm:$0xff]  ;;  %v784_v4 = vld [vmem:[%s2161_s5 + $0x128] sm:$0xff] }
 0x115   : > { %v1694_v1 = vunpack.i.h.bf16 %v1692_v62  ;;  %v1693_v2 = vunpack.i.l.bf16 %v1692_v62  ;;  %v1709_v14 = vunpack.i.h.bf16 %v1707_v61  ;;  %v1708_v15 = vunpack.i.l.bf16 %v1707_v61  ;;  %v749_v61 = vld [vmem:[%s2161_s5 + $0x10] sm:$0xff]  ;;  %v750_v62 = vld [vmem:[%s2161_s5 + $0x18] sm:$0xff]  ;;  %v792_v42 = vld [vmem:[%s2161_s5 + $0x168] sm:$0xff] }
 0x116   : > { %1484 = vmatpush1.bf16.msra.mxu0 %v1483_v63  ;;  %1498 = vmatpush3.bf16.msra.mxu1 %v1497_v0  ;;  %v1904_v57 = vpack.c.bf16 %v748_v48, %v747_v47  ;;  %v1912_v60 = vpack.c.bf16 %v766_v50, %v765_v49  ;;  %v767_v63 = vld [vmem:[%s2161_s5 + $0xa0] sm:$0xff]  ;;  %v768_v0 = vld [vmem:[%s2161_s5 + $0xa8] sm:$0xff]  ;;  %v793_v48 = vld [vmem:[%s2161_s5 + $0x170] sm:$0xff] }
 0x117   : > { %v494_v6 = vsel %vm492_vm5, %v1693_v2, %v1694_v1  ;;  %1499 = vmatprep.subr.bf16.mxu1 %v1750_v19  ;;  %v512_v27 = vsel %vm510_vm6, %v1708_v15, %v1709_v14  ;;  %v760_v46 = vld [vmem:[%s2161_s5 + $0x68] sm:$0xff]  ;;  %v794_v49 = vld [vmem:[%s2161_s5 + $0x178] sm:$0xff] }
 0x118   : > { %v1702_v7 = vpop.permute.xlu1 %1701  ;;  %v1485_v8 = vpack.c.bf16 %v494_v6, %v476_v5  ;;  %v1717_v11 = vpop.permute.xlu0 %1716  ;;  %v1942_v5 = vpack.c.bf16 %v768_v0, %v767_v63  ;;  %v751_v6 = vld [vmem:[%s2161_s5 + $0x20] sm:$0xff]  ;;  %v2081_v50 = vpack.c.bf16 %v794_v49, %v793_v48 }
 0x119   : > { %v1704_v9 = vunpack.i.h.bf16 %v1702_v7  ;;  %v1703_v10 = vunpack.i.l.bf16 %v1702_v7  ;;  %v1719_v25 = vunpack.i.h.bf16 %v1717_v11  ;;  %v1718_v26 = vunpack.i.l.bf16 %v1717_v11  ;;  %v752_v7 = vld [vmem:[%s2161_s5 + $0x28] sm:$0xff] }
 0x11a   : > { %1486 = vmatprep.subr.bf16.mxu0 %v1485_v8  ;;  %v769_v8 = vld [vmem:[%s2161_s5 + $0xb0] sm:$0xff]  ;;  %v1962_v11 = vpack.c.bf16 %v752_v7, %v751_v6 }
 0x11b   : > { %v493_v16 = vsel %vm492_vm5, %v1703_v10, %v1693_v2  ;;  %v495_v17 = vsel %vm492_vm5, %v1694_v1, %v1704_v9  ;;  %v511_v34 = vsel %vm510_vm6, %v1718_v26, %v1708_v15  ;;  %v513_v36 = vsel %vm510_vm6, %v1709_v14, %v1719_v25  ;;  %v770_v9 = vld [vmem:[%s2161_s5 + $0xb8] sm:$0xff]  ;;  %v753_v15 = vld [vmem:[%s2161_s5 + $0x30] sm:$0xff]  ;;  %v755_v26 = vld [vmem:[%s2161_s5 + $0x40] sm:$0xff] }
 0x11c   : > { %v1712_v18 = vpop.permute.xlu1 %1711  ;;  %v1487_v20 = vpack.c.bf16 %v493_v16, %v475_v12  ;;  %v1500_v21 = vpack.c.bf16 %v495_v17, %v477_v13  ;;  %v541_v29 = vpop.permute.xlu0 %540  ;;  %v1930_v1 = vpack.c.bf16 %v782_v59, %v781_v58  ;;  %v1932_v2 = vpack.c.bf16 %v750_v62, %v749_v61  ;;  %v785_v12 = vld [vmem:[%s2161_s5 + $0x130] sm:$0xff]  ;;  %v786_v13 = vld [vmem:[%s2161_s5 + $0x138] sm:$0xff]  ;;  %v771_v17 = vld [vmem:[%s2161_s5 + $0xc0] sm:$0xff] }
 0x11d   : > { %v1714_v22 = vunpack.i.h.bf16 %v1712_v18  ;;  %v1713_v23 = vunpack.i.l.bf16 %v1712_v18  ;;  %v1960_v10 = vpack.c.bf16 %v784_v4, %v783_v3  ;;  %v1972_v14 = vpack.c.bf16 %v770_v9, %v769_v8  ;;  %v754_v16 = vld [vmem:[%s2161_s5 + $0x38] sm:$0xff]  ;;  %v772_v18 = vld [vmem:[%s2161_s5 + $0xc8] sm:$0xff] }
 0x11e   : > { %1488 = vmatpush1.bf16.msra.mxu0 %v1487_v20  ;;  %1501 = vmatpush3.bf16.msra.mxu1 %v1500_v21  ;;  %v1988_v20 = vpack.c.bf16 %v786_v13, %v785_v12  ;;  %v1990_v21 = vpack.c.bf16 %v754_v16, %v753_v15  ;;  %v2000_v25 = vpack.c.bf16 %v772_v18, %v771_v17  ;;  %v762_v58 = vld [vmem:[%s2161_s5 + $0x78] sm:$0xff] }
 0x11f   : > { %v530_v28 = vsel %vm528_vm7, %v1713_v23, %v1714_v22  ;;  %1502 = vmatprep.subr.bf16.mxu1 %v1750_v19 }
 0x120   : > { %v1722_v30 = vpop.permute.xlu1 %1721  ;;  %v1489_v31 = vpack.c.bf16 %v530_v28, %v512_v27  ;;  %v539_v45 = vpop.permute.xlu0 %538  ;;  %v756_v27 = vld [vmem:[%s2161_s5 + $0x48] sm:$0xff]  ;;  %v773_v28 = vld [vmem:[%s2161_s5 + $0xd0] sm:$0xff] }
 0x121   : > { %v1724_v32 = vunpack.i.h.bf16 %v1722_v30  ;;  %v1723_v33 = vunpack.i.l.bf16 %v1722_v30  ;;  %v547_v54 = vsel %vm546_vm8, %v539_v45, %v541_v29  ;;  %v759_v45 = vld [vmem:[%s2161_s5 + $0x60] sm:$0xff] }
 0x122   : > { %1490 = vmatprep.subr.bf16.mxu0 %v1489_v31  ;;  %v2018_v31 = vpack.c.bf16 %v756_v27, %v755_v26  ;;  %v2072_v47 = vpack.c.bf16 %v760_v46, %v759_v45 }
 0x123   : > { %v529_v35 = vsel %vm528_vm7, %v1723_v33, %v1713_v23  ;;  %v531_v37 = vsel %vm528_vm7, %v1714_v22, %v1724_v32  ;;  %v787_v22 = vld [vmem:[%s2161_s5 + $0x140] sm:$0xff]  ;;  %v788_v23 = vld [vmem:[%s2161_s5 + $0x148] sm:$0xff]  ;;  %v789_v32 = vld [vmem:[%s2161_s5 + $0x150] sm:$0xff] }
 0x124   : > { %v543_v38 = vpop.permute.xlu1 %542  ;;  %v1491_v39 = vpack.c.bf16 %v529_v35, %v511_v34  ;;  %v1503_v40 = vpack.c.bf16 %v531_v37, %v513_v36  ;;  %v2016_v30 = vpack.c.bf16 %v788_v23, %v787_v22  ;;  %v790_v33 = vld [vmem:[%s2161_s5 + $0x158] sm:$0xff]  ;;  %v757_v35 = vld [vmem:[%s2161_s5 + $0x50] sm:$0xff]  ;;  %v775_v37 = vld [vmem:[%s2161_s5 + $0xe0] sm:$0xff] }
 0x125   : > { %v548_v41 = vsel %vm546_vm8, %v541_v29, %v543_v38  ;;  %v774_v29 = vld [vmem:[%s2161_s5 + $0xd8] sm:$0xff] }
 0x126   : > { %1492 = vmatpush1.bf16.msra.mxu0 %v1491_v39  ;;  %1504 = vmatpush3.bf16.msra.mxu1 %v1503_v40  ;;  %v2028_v34 = vpack.c.bf16 %v774_v29, %v773_v28  ;;  %v758_v36 = vld [vmem:[%s2161_s5 + $0x58] sm:$0xff]  ;;  %v2044_v39 = vpack.c.bf16 %v790_v33, %v789_v32 }
 0x127   : > { %610 = vmatprep.subr.mxu0 %v548_v41  ;;  %1402 = vmatprep.subr.mxu1 %v1757_v24  ;;  %v2046_v40 = vpack.c.bf16 %v758_v36, %v757_v35  ;;  %v791_v41 = vld [vmem:[%s2161_s5 + $0x160] sm:$0xff] }
 0x128   : > { %v545_v51 = vpop.permute.xlu1 %544  ;;  %v2060_v44 = vpack.c.bf16 %v792_v42, %v791_v41 }
 0x129   : > { %v549_v55 = vsel %vm546_vm8, %v543_v38, %v545_v51  ;;  %v776_v38 = vld [vmem:[%s2161_s5 + $0xe8] sm:$0xff]  ;;  %v777_v51 = vld [vmem:[%s2161_s5 + $0xf0] sm:$0xff] }
 0x12a   : > { %611 = vmatpush1.msra.mxu0 %v547_v54  ;;  %1403 = vmatpush3.msra.mxu1 %v549_v55  ;;  %v2056_v43 = vpack.c.bf16 %v776_v38, %v775_v37  ;;  %v761_v55 = vld [vmem:[%s2161_s5 + $0x70] sm:$0xff] }
 0x12b   : > { %1267 = vmatmul.mubr.msk.f32.vlgmr.msra.gmra.mrb[0].mxu0 %vm590_vm9, %v556_v52  ;;  %1405 = vmatmul.mubr.msk.f32.vlgmr.msra.gmra.mrb[0].mxu1 %vm590_vm9, %v556_v52  ;;  %v778_v52 = vld [vmem:[%s2161_s5 + $0xf8] sm:$0xff]  ;;  %v2098_v59 = vpack.c.bf16 %v762_v58, %v761_v55 }
 0x12c   : > { %1537 = vmatprep.subr.bf16.mxu1 %v1750_v19  ;;  %1506 = vmatprep.subr.bf16.mxu0 %v1898_v53  ;;  %v2089_v54 = vpack.c.bf16 %v778_v52, %v777_v51 }
 0x12d   : > { %1539 = vmatpush3.bf16.msra.mxu1 %v1902_v56  ;;  %1508 = vmatpush3.bf16.msra.mxu0 %v1904_v57 }
 0x12e   : > { %1540 = vmatprep.subr.bf16.mxu1 %v1750_v19  ;;  %1510 = vmatprep.subr.bf16.mxu0 %v1912_v60 }
 0x12f   : > { %1439 = vmatprep.mubr.msk.f32.mxu1 %vm1760_vm0, %v1757_v24 }
 0x131   : > { %1542 = vmatpush3.bf16.msra.mxu1 %v1930_v1  ;;  %1512 = vmatpush3.bf16.msra.mxu0 %v1932_v2  ;;  %v588_v61 = vpop.permute.xlu0 %587 }
 0x132   : > { %1543 = vmatprep.subr.bf16.mxu1 %v1750_v19  ;;  %1514 = vmatprep.subr.bf16.mxu0 %v1942_v5 }
 0x135   : > { %1545 = vmatpush3.bf16.msra.mxu1 %v1960_v10  ;;  %1516 = vmatpush3.bf16.msra.mxu0 %v1962_v11 }
 0x136   : > { %1546 = vmatprep.subr.bf16.mxu1 %v1750_v19  ;;  %1518 = vmatprep.subr.bf16.mxu0 %v1972_v14 }
 0x139   : > { %1548 = vmatpush3.bf16.msra.mxu1 %v1988_v20  ;;  %1520 = vmatpush3.bf16.msra.mxu0 %v1990_v21 }
 0x13a   : > { %1549 = vmatprep.subr.bf16.mxu1 %v1750_v19  ;;  %1522 = vmatprep.subr.bf16.mxu0 %v2000_v25 }
 0x13d   : > { %1551 = vmatpush3.bf16.msra.mxu1 %v2016_v30  ;;  %1524 = vmatpush3.bf16.msra.mxu0 %v2018_v31 }
 0x13e   : > { %1552 = vmatprep.subr.bf16.mxu1 %v1750_v19  ;;  %1526 = vmatprep.subr.bf16.mxu0 %v2028_v34 }
 0x141   : > { %1554 = vmatpush3.bf16.msra.mxu1 %v2044_v39  ;;  %1528 = vmatpush3.bf16.msra.mxu0 %v2046_v40 }
 0x142   : > { %1555 = vmatprep.subr.bf16.mxu1 %v1750_v19  ;;  %1530 = vmatprep.subr.bf16.mxu0 %v2056_v43 }
 0x145   : > { %1557 = vmatpush3.bf16.msra.mxu1 %v2060_v44  ;;  %1532 = vmatpush3.bf16.msra.mxu0 %v2072_v47 }
 0x146   : > { %1558 = vmatprep.subr.bf16.mxu1 %v1750_v19  ;;  %1534 = vmatprep.subr.bf16.mxu0 %v2089_v54 }
 0x149   : > { %1560 = vmatpush3.bf16.msra.mxu1 %v2081_v50  ;;  %1536 = vmatpush3.bf16.msra.mxu0 %v2098_v59 }
 0x14a   : > { %1593 = vmatprep.subr.bf16.mxu1 %v1750_v19  ;;  %1562 = vmatprep.subr.bf16.mxu0 %v1898_v53 }
 0x1fe   : > { %v660_v62 = vpop.f32.mrb[0].mxu0  ;;  %v731_v63 = vpop.f32.mrb[0].mxu1 }
 0x1ff   : > { %v661_v0 = vadd.f32 %v660_v62, %v588_v61  ;;  %v732_v3 = vadd.f32 %v731_v63, %v588_v61  ;;  %v662_v4 = vpop.f32.mrb[1].mxu0  ;;  %v1406_v6 = vpop.f32.mrb[1].mxu1 }
 0x200   : > { %v663_v7 = vadd.f32 %v662_v4, %v588_v61 }
 0x201   : > { %vm735_vm10 = vcmp.ge.f32.partialorder %v661_v0, 0.0  ;;  %v738_v8 = vmul.f32 0.01, %v661_v0  ;;  %vm737_vm11 = vcmp.ge.f32.partialorder %v732_v3, 0.0  ;;  %v740_v9 = vmul.f32 0.01, %v732_v3 }
 0x202   : > { %v739_v12 = vmul.f32 0.01, %v663_v7  ;;  %vm736_vm12 = vcmp.ge.f32.partialorder %v663_v7, 0.0 }
 0x203   : > { %v743_v53 = vsel %vm737_vm11, %v732_v3, %v740_v9  ;;  %v741_v13 = vsel %vm735_vm10, %v661_v0, %v738_v8 }
 0x204   : > { %746 = vst [vmem:[%s362_s20 + $0x10] sm:$0xff] %v743_v53  ;;  %1440 = vmatmul.mubr.f32.vlgmr.msra.gmra.mrb[2].mxu1 %v743_v53  ;;  %v742_v15 = vsel %vm736_vm12, %v663_v7, %v739_v12  ;;  %744 = vst [vmem:[%s362_s20] sm:$0xff] %v741_v13 }
 0x205   : > { %1595 = vmatpush3.bf16.msra.mxu1 %v1902_v56  ;;  %745 = vst [vmem:[%s362_s20 + $0x8] sm:$0xff] %v742_v15  ;;  %859 = vmatprep.mubr.f32.mxu0 %v742_v15  ;;  %v936_v16 = vmul.f32 %v742_v15, %v742_v15  ;;  %v935_v56 = vmul.f32 %v741_v13, %v741_v13 }
 0x206   : > { %860 = vmatmul.mubr.f32.vlgmr.msra.gmra.mrb[2].mxu0 %v741_v13  ;;  %1596 = vmatprep.subr.bf16.mxu1 %v1750_v19 }
 0x207   : > { %1564 = vmatpush3.bf16.msra.mxu0 %v1904_v57  ;;  %1002 = vmatprep.mubr.f32.mxu0 %v936_v16 }
 0x208   : > { %1566 = vmatprep.subr.bf16.mxu0 %v1912_v60  ;;  %1474 = vmatprep.mubr.msk.f32.mxu1 %vm1760_vm0, %v1757_v24  ;;  %v937_v24 = vmul.f32 %v743_v53, %v743_v53 }
 0x209   : > { %1598 = vmatpush3.bf16.msra.mxu1 %v1930_v1 }
 0x20a   : > { %1599 = vmatprep.subr.bf16.mxu1 %v1750_v19 }
 0x20b   : > { %1568 = vmatpush3.bf16.msra.mxu0 %v1932_v2 }
 0x20c   : > { %1570 = vmatprep.subr.bf16.mxu0 %v1942_v5 }
 0x20d   : > { %1601 = vmatpush3.bf16.msra.mxu1 %v1960_v10 }
 0x20e   : > { %1602 = vmatprep.subr.bf16.mxu1 %v1750_v19 }
 0x20f   : > { %1572 = vmatpush3.bf16.msra.mxu0 %v1962_v11 }
 0x210   : > { %1574 = vmatprep.subr.bf16.mxu0 %v1972_v14 }
 0x211   : > { %1604 = vmatpush3.bf16.msra.mxu1 %v1988_v20 }
 0x212   : > { %1605 = vmatprep.subr.bf16.mxu1 %v1750_v19 }
 0x213   : > { %1576 = vmatpush3.bf16.msra.mxu0 %v1990_v21 }
 0x214   : > { %1578 = vmatprep.subr.bf16.mxu0 %v2000_v25 }
 0x215   : > { %1607 = vmatpush3.bf16.msra.mxu1 %v2016_v30 }
 0x216   : > { %1608 = vmatprep.subr.bf16.mxu1 %v1750_v19 }
 0x217   : > { %1580 = vmatpush3.bf16.msra.mxu0 %v2018_v31 }
 0x218   : > { %1582 = vmatprep.subr.bf16.mxu0 %v2028_v34 }
 0x219   : > { %1610 = vmatpush3.bf16.msra.mxu1 %v2044_v39 }
 0x21a   : > { %1611 = vmatprep.subr.bf16.mxu1 %v1750_v19 }
 0x21b   : > { %1584 = vmatpush3.bf16.msra.mxu0 %v2046_v40 }
 0x21c   : > { %1586 = vmatprep.subr.bf16.mxu0 %v2056_v43 }
 0x21d   : > { %1613 = vmatpush3.bf16.msra.mxu1 %v2060_v44 }
 0x21e   : > { %1614 = vmatprep.subr.bf16.mxu1 %v1750_v19 }
 0x21f   : > { %1588 = vmatpush3.bf16.msra.mxu0 %v2072_v47 }
 0x220   : > { %1590 = vmatprep.subr.bf16.mxu0 %v2089_v54 }
 0x221   : > { %1616 = vmatpush3.bf16.msra.mxu1 %v2081_v50 }
 0x223   : > { %1592 = vmatpush3.bf16.msra.mxu0 %v2098_v59 }
 0x224   : > { %1475 = vmatmul.mubr.f32.vlgmr.msra.gmra.mrb[4].mxu1 %v937_v24 }
 0x226   : > { %1003 = vmatmul.mubr.f32.vlgmr.msra.gmra.mrb[4].mxu0 %v935_v56 }
 0x2d7   : > { %v931_v57 = vpop.f32.mrb[2].mxu1 }
 0x2d8   : > { %v1441_v60 = vpop.f32.mrb[3].mxu1 }
 0x2d9   : > { %v1314_v1 = vpop.f32.mrb[2].mxu0 }
 0x2da   : > { %v1315_v2 = vpop.f32.mrb[3].mxu0 }
 0x2db   : > { %v1316_v5 = vadd.f32 %v1315_v2, %v1314_v1 }
 0x2dd   : > { %v932_v19 = vadd.f32 %v1316_v5, %v931_v57 }
 0x2df   : > { %1083 = vst.msk [vmem:[%s367_s24] sm:$0xff] %vm1082_vm13, %v932_v19 }
 0x2f7   : > { %v1074_v10 = vpop.f32.mrb[4].mxu1 }
 0x2f8   : > { %v1476_v11 = vpop.f32.mrb[5].mxu1 }
 0x2f9   : > { %v1366_v14 = vpop.f32.mrb[4].mxu0 }
 0x2fa   : > { %v1367_v17 = vpop.f32.mrb[5].mxu0 }
 0x2fb   : > { %v1368_v18 = vadd.f32 %v1367_v17, %v1366_v14 }
 0x2fd   : > { %v1075_v20 = vadd.f32 %v1368_v18, %v1074_v10 }
 0x2ff   : > { %1084 = vst.msk [vmem:[%s371_s9] sm:$0xff] %vm1082_vm13, %v1075_v20 }
 0x300 PF: > { %s19_s29 = sadd.s32 1, %s1747_s29   ;;  %s2165_s27 = smov %s1743_s28 }
 0x301   : > { %p16_p5 = scmp.ge.s32.totalorder %s19_s29, 4   ;;  %s2166_s28 = smov %s2168_s30 }
 0x303   :  { %18 = sbr.rel (!%p16_p5) target bundleno = 2 (0x2), region = 110 }

// kernel: encoder_forward.7
= control target key start
LH: loop header
LB: loop body
LE: loop exit
PB: predicated region body
PF: predicated region fallthrough
CT: control target
= control target key end

     0   :  { %s1031_s21 = smov 0   ;;  %s1033_s22 = smov 0   ;;  %s1113_s0 = inlined_call_operand.vmem [shape: f32[2,8,512], index: 0, kind: input, shape index: {}]   ;;  %s1114_s1 = inlined_call_operand.vmem [shape: f32[8,72], index: 1, kind: input, shape index: {}]   ;;  %s1115_s2 = inlined_call_operand.vmem [shape: f32[8,1], index: 2, kind: input, shape index: {}]   ;;  %s1116_s3 = inlined_call_operand.vmem [shape: f32[8,1], index: 3, kind: input, shape index: {}]   ;;  %s1117_s4 = inlined_call_operand.vmem [shape: f32[8,1], index: 4, kind: input, shape index: {}]   ;;  %s1118_s5 = inlined_call_operand.vmem [shape: f32[2,8,512], index: 5, kind: input, shape index: {}]   ;;  %s1119_s6 = inlined_call_operand.vmem [shape: f32[2,8,384], index: 6, kind: output, shape index: {}]  }
   0x1   :  { %s1035_s23 = smov 0  }
   0x2 LB: > { %s28_s24 = sadd.s32 1, %s978_s22  ;;  %p781_p0 = scmp.ge.s32.totalorder %s982_s23, 1  ;;  %s982_s23 = sphi %s1035_s23, %s16_s23   ;;  %s978_s22 = sphi %s1033_s22, %s1121_s22   ;;  %s974_s21 = sphi %s1031_s21, %s1120_s21  }
   0x3   : > { %p30_p1 = scmp.ge.s32.totalorder %s28_s24, 2  ;;  %p236_p2 = scmp.lt.s32.totalorder %s982_s23, 3 }
   0x5   : > { %s1123_s24 = smov (%p30_p1, %s28_s24), 0  ;;  %p237_p3 = pnand %p781_p0, %p236_p2 }
   0x6   : > { %v304_v0 = vld [vmem:[%s1116_s3] sm:$0xff] (!%p237_p3)  ;;  %v984_v1 = vmov (!%p237_p3), 0   ;;  %p275_p4 = scmp.lt.s32.totalorder (!%p237_p3), %s974_s21, 1  ;;  %v985_v27 = vmov (!%p237_p3), 0.0|0.0   ;;  %s986_s12 = smov (!%p237_p3), 126   ;;  %v992_v32 = vmov (!%p237_p3), 0.0  }
   0x7   : > { %240 = sbr.rel (%p237_p3) target bundleno = 520 (0x208), region = 44  ;;  %889 = vset.pattern.permute.xlu0 (!%p237_p3), %v984_v1  ;;  %v314_v2 = vld [vmem:[%s1117_s4] sm:$0xff] (!%p237_p3)  ;;  %840 = vmatprep.subr.bf16.mxu1 (!%p237_p3), %v985_v27  ;;  %s987_s13 = smov (!%p237_p3), 127   ;;  %vm995_vm0 = vmmov (!%p237_p3), 0   ;;  %vm353_vm1 = vcmask (!%p237_p3), 1039360   ;;  %vm371_vm2 = vcmask (!%p237_p3), 1031168  }
   0x8   : > { %307 = vperm.xlu0 (!%p237_p3), %889, %v304_v0   ;;  %s988_s14 = smov (!%p237_p3), 109   ;;  %s989_s15 = smov (!%p237_p3), 110   ;;  %591 = vmatprep.mubr.f32.mxu0 (!%p237_p3), %v992_v32  ;;  %v517_v33 = vld [vmem:[%s1115_s2] sm:$0xff] (!%p237_p3)  ;;  %vm389_vm3 = vcmask (!%p237_p3), 900096   ;;  %vm407_vm4 = vcmask (!%p237_p3), 891904   ;;  %vm425_vm5 = vcmask (!%p237_p3), 883712  }
   0x9   : > { %s990_s16 = smov (!%p237_p3), 92   ;;  %s991_s17 = smov (!%p237_p3), 108   ;;  %821 = vmatprep.mubr.msk.f32.mxu1 (!%p237_p3), %vm995_vm0, %v992_v32  ;;  %vm443_vm6 = vcmask (!%p237_p3), 752640   ;;  %vm461_vm7 = vcmask (!%p237_p3), 744448   ;;  %vm479_vm8 = vcmask (!%p237_p3), 736256   ;;  %vm523_vm9 = vcmask (!%p237_p3), 588800  }
   0xa   : > { %s993_s18 = smov (!%p237_p3), 90   ;;  %s994_s19 = smov (!%p237_p3), 91  }
   0xc   : > { %317 = vperm.xlu0 (!%p237_p3), %889, %v314_v2  }
   0xe   : > { %s1125_s21 = smov (!%p275_p4, %s974_s21), 1 }
   0xf   : > { %s791_s29 = sshll.u32 %s1125_s21, 5  ;;  %s852_s28 = smul.u32 24, %s1125_s21 }
  0x10   : > { %s279_s8 = scalar_lea.vmem %s1113_s0, %s791_s29  ;;  %s284_s11 = scalar_lea.vmem %s1118_s5, %s791_s29 }
  0x11   : > { %v300_v3 = vld [vmem:[%s279_s8] sm:$0xff]  ;;  %v301_v5 = vld [vmem:[%s279_s8 + $0x8] sm:$0xff]  ;;  %v302_v6 = vld [vmem:[%s279_s8 + $0x10] sm:$0xff]  ;;  %s293_s7 = scalar_lea.vmem %s1119_s6, %s852_s28 }
  0x12   : > { %v303_v7 = vld [vmem:[%s279_s8 + $0x18] sm:$0xff]  ;;  %v326_v12 = vld [vmem:[%s284_s11] sm:$0xff]  ;;  %v327_v14 = vld [vmem:[%s284_s11 + $0x8] sm:$0xff] }
  0x13   : > { %v328_v15 = vld [vmem:[%s284_s11 + $0x10] sm:$0xff]  ;;  %v329_v16 = vld [vmem:[%s284_s11 + $0x18] sm:$0xff] }
  0x87   : > { %v308_v4 = vpop.permute.xlu0 %307 }
  0x88   : > { %v310_v8 = vmul.f32 %v308_v4, %v300_v3  ;;  %v311_v9 = vmul.f32 %v308_v4, %v301_v5  ;;  %v312_v10 = vmul.f32 %v308_v4, %v302_v6  ;;  %v313_v11 = vmul.f32 %v308_v4, %v303_v7 }
  0x8b   : > { %v318_v13 = vpop.permute.xlu0 %317 }
  0x8c   : > { %v320_v17 = vadd.f32 %v318_v13, %v310_v8  ;;  %v321_v18 = vadd.f32 %v318_v13, %v311_v9  ;;  %v322_v19 = vadd.f32 %v318_v13, %v312_v10  ;;  %v323_v20 = vadd.f32 %v318_v13, %v313_v11 }
  0x8e   : > { %v330_v21 = vadd.f32 %v326_v12, %v320_v17  ;;  %v331_v22 = vadd.f32 %v327_v14, %v321_v18  ;;  %v332_v23 = vadd.f32 %v328_v15, %v322_v19  ;;  %v333_v24 = vadd.f32 %v329_v16, %v323_v20 }
  0x90   : > { %v335_v25 = vmax.f32 %v331_v22, 0.0  ;;  %v1064_v26 = vmax.f32 %v332_v23, 0.0  ;;  %v334_v28 = vmax.f32 %v330_v21, 0.0  ;;  %v337_v29 = vmax.f32 %v333_v24, 0.0 }
  0x92   : > { %v900_v30 = vpack.i.bf16 %v1064_v26, %v335_v25  ;;  %v910_v31 = vpack.i.bf16 %v337_v29, %v334_v28 }
  0x94   : > { %901 = vrot.lane.b32.xlu0 %v900_v30, %s986_s12  ;;  %891 = vrot.lane.b32.xlu1 %v900_v30, %s987_s13 }
  0x98   : > { %911 = vrot.lane.b32.xlu0 %v910_v31, %s986_s12  ;;  %896 = vrot.lane.b32.xlu1 %v910_v31, %s987_s13 }
  0x9c   : > { %921 = vrot.lane.b32.xlu0 %v900_v30, %s988_s14  ;;  %906 = vrot.lane.b32.xlu1 %v900_v30, %s989_s15 }
  0xa0   : > { %931 = vrot.lane.b32.xlu0 %v910_v31, %s988_s14  ;;  %916 = vrot.lane.b32.xlu1 %v910_v31, %s989_s15 }
  0xa4   : > { %941 = vrot.lane.b32.xlu0 %v900_v30, %s990_s16  ;;  %926 = vrot.lane.b32.xlu1 %v900_v30, %s991_s17 }
  0xa8   : > { %951 = vrot.lane.b32.xlu0 %v910_v31, %s990_s16  ;;  %936 = vrot.lane.b32.xlu1 %v910_v31, %s991_s17 }
  0xac   : > { %473 = vrot.lane.b32.xlu0 %v335_v25, %s993_s18  ;;  %946 = vrot.lane.b32.xlu1 %v900_v30, %s994_s19 }
  0xb0   : > { %471 = vrot.lane.b32.xlu0 %v334_v28, %s993_s18  ;;  %956 = vrot.lane.b32.xlu1 %v910_v31, %s994_s19 }
  0xb4   : > { %520 = vperm.xlu0 %889, %v517_v33   ;;  %475 = vrot.lane.b32.xlu1 %v1064_v26, %s993_s18 }
  0xb8   : > { %477 = vrot.lane.b32.xlu1 %v337_v29, %s993_s18 }
 0x106   : > { %v902_v34 = vpop.permute.xlu0 %901  ;;  %v892_v35 = vpop.permute.xlu1 %891 }
 0x107   : > { %v894_v36 = vunpack.i.h.bf16 %v892_v35  ;;  %v893_v37 = vunpack.i.l.bf16 %v892_v35  ;;  %v904_v44 = vunpack.i.h.bf16 %v902_v34  ;;  %v903_v45 = vunpack.i.l.bf16 %v902_v34 }
 0x109   : > { %v355_v38 = vsel %vm353_vm1, %v893_v37, %v894_v36  ;;  %v373_v56 = vsel %vm371_vm2, %v903_v45, %v904_v44 }
 0x10a   : > { %v912_v39 = vpop.permute.xlu0 %911  ;;  %v897_v40 = vpop.permute.xlu1 %896  ;;  %v824_v41 = vpack.c.bf16 %v355_v38, %v335_v25 }
 0x10b   : > { %v899_v42 = vunpack.i.h.bf16 %v897_v40  ;;  %v898_v43 = vunpack.i.l.bf16 %v897_v40  ;;  %v914_v54 = vunpack.i.h.bf16 %v912_v39  ;;  %v913_v55 = vunpack.i.l.bf16 %v912_v39 }
 0x10c   : > { %825 = vmatprep.subr.bf16.mxu0 %v824_v41 }
 0x10d   : > { %v354_v46 = vsel %vm353_vm1, %v898_v43, %v893_v37  ;;  %v356_v47 = vsel %vm353_vm1, %v894_v36, %v899_v42  ;;  %v372_v63 = vsel %vm371_vm2, %v913_v55, %v903_v45  ;;  %v374_v0 = vsel %vm371_vm2, %v904_v44, %v914_v54 }
 0x10e   : > { %v922_v48 = vpop.permute.xlu0 %921  ;;  %v907_v49 = vpop.permute.xlu1 %906  ;;  %v826_v50 = vpack.c.bf16 %v354_v46, %v334_v28  ;;  %v841_v51 = vpack.c.bf16 %v356_v47, %v1064_v26 }
 0x10f   : > { %v909_v52 = vunpack.i.h.bf16 %v907_v49  ;;  %v908_v53 = vunpack.i.l.bf16 %v907_v49  ;;  %v924_v1 = vunpack.i.h.bf16 %v922_v48  ;;  %v923_v2 = vunpack.i.l.bf16 %v922_v48 }
 0x110   : > { %827 = vmatpush1.bf16.msra.mxu0 %v826_v50  ;;  %842 = vmatpush3.bf16.msra.mxu1 %v841_v51  ;;  %v489_v51 = vld [vmem:[%s1114_s1] sm:$0xff] }
 0x111   : > { %v391_v57 = vsel %vm389_vm3, %v908_v53, %v909_v52  ;;  %843 = vmatprep.subr.bf16.mxu1 %v985_v27  ;;  %v409_v13 = vsel %vm407_vm4, %v923_v2, %v924_v1 }
 0x112   : > { %v932_v58 = vpop.permute.xlu0 %931  ;;  %v917_v59 = vpop.permute.xlu1 %916  ;;  %v828_v60 = vpack.c.bf16 %v391_v57, %v373_v56 }
 0x113   : > { %v919_v61 = vunpack.i.h.bf16 %v917_v59  ;;  %v918_v62 = vunpack.i.l.bf16 %v917_v59  ;;  %v934_v11 = vunpack.i.h.bf16 %v932_v58  ;;  %v933_v12 = vunpack.i.l.bf16 %v932_v58 }
 0x114   : > { %829 = vmatprep.subr.bf16.mxu0 %v828_v60 }
 0x115   : > { %v390_v3 = vsel %vm389_vm3, %v918_v62, %v908_v53  ;;  %v392_v4 = vsel %vm389_vm3, %v909_v52, %v919_v61  ;;  %v408_v20 = vsel %vm407_vm4, %v933_v12, %v923_v2  ;;  %v410_v21 = vsel %vm407_vm4, %v924_v1, %v934_v11 }
 0x116   : > { %v942_v5 = vpop.permute.xlu0 %941  ;;  %v927_v6 = vpop.permute.xlu1 %926  ;;  %v830_v7 = vpack.c.bf16 %v390_v3, %v372_v63  ;;  %v844_v8 = vpack.c.bf16 %v392_v4, %v374_v0 }
 0x117   : > { %v929_v9 = vunpack.i.h.bf16 %v927_v6  ;;  %v928_v10 = vunpack.i.l.bf16 %v927_v6  ;;  %v944_v22 = vunpack.i.h.bf16 %v942_v5  ;;  %v943_v23 = vunpack.i.l.bf16 %v942_v5 }
 0x118   : > { %831 = vmatpush1.bf16.msra.mxu0 %v830_v7  ;;  %845 = vmatpush3.bf16.msra.mxu1 %v844_v8 }
 0x119   : > { %v427_v14 = vsel %vm425_vm5, %v928_v10, %v929_v9  ;;  %846 = vmatprep.subr.bf16.mxu1 %v985_v27  ;;  %v445_v35 = vsel %vm443_vm6, %v943_v23, %v944_v22 }
 0x11a   : > { %v937_v15 = vpop.permute.xlu1 %936  ;;  %v832_v16 = vpack.c.bf16 %v427_v14, %v409_v13  ;;  %v952_v19 = vpop.permute.xlu0 %951 }
 0x11b   : > { %v939_v17 = vunpack.i.h.bf16 %v937_v15  ;;  %v938_v18 = vunpack.i.l.bf16 %v937_v15  ;;  %v954_v33 = vunpack.i.h.bf16 %v952_v19  ;;  %v953_v34 = vunpack.i.l.bf16 %v952_v19 }
 0x11c   : > { %833 = vmatprep.subr.bf16.mxu0 %v832_v16 }
 0x11d   : > { %v426_v24 = vsel %vm425_vm5, %v938_v18, %v928_v10  ;;  %v428_v25 = vsel %vm425_vm5, %v929_v9, %v939_v17  ;;  %v444_v42 = vsel %vm443_vm6, %v953_v34, %v943_v23  ;;  %v446_v44 = vsel %vm443_vm6, %v944_v22, %v954_v33 }
 0x11e   : > { %v947_v26 = vpop.permute.xlu1 %946  ;;  %v834_v28 = vpack.c.bf16 %v426_v24, %v408_v20  ;;  %v847_v29 = vpack.c.bf16 %v428_v25, %v410_v21  ;;  %v474_v37 = vpop.permute.xlu0 %473 }
 0x11f   : > { %v949_v30 = vunpack.i.h.bf16 %v947_v26  ;;  %v948_v31 = vunpack.i.l.bf16 %v947_v26 }
 0x120   : > { %835 = vmatpush1.bf16.msra.mxu0 %v834_v28  ;;  %848 = vmatpush3.bf16.msra.mxu1 %v847_v29 }
 0x121   : > { %v463_v36 = vsel %vm461_vm7, %v948_v31, %v949_v30  ;;  %849 = vmatprep.subr.bf16.mxu1 %v985_v27 }
 0x122   : > { %v957_v38 = vpop.permute.xlu1 %956  ;;  %v836_v39 = vpack.c.bf16 %v463_v36, %v445_v35  ;;  %v472_v27 = vpop.permute.xlu0 %471 }
 0x123   : > { %v959_v40 = vunpack.i.h.bf16 %v957_v38  ;;  %v958_v41 = vunpack.i.l.bf16 %v957_v38  ;;  %v480_v52 = vsel %vm479_vm8, %v472_v27, %v474_v37 }
 0x124   : > { %837 = vmatprep.subr.bf16.mxu0 %v836_v39 }
 0x125   : > { %v462_v43 = vsel %vm461_vm7, %v958_v41, %v948_v31  ;;  %v464_v45 = vsel %vm461_vm7, %v949_v30, %v959_v40 }
 0x126   : > { %v476_v46 = vpop.permute.xlu1 %475  ;;  %v838_v47 = vpack.c.bf16 %v462_v43, %v444_v42  ;;  %v850_v48 = vpack.c.bf16 %v464_v45, %v446_v44 }
 0x127   : > { %v481_v49 = vsel %vm479_vm8, %v474_v37, %v476_v46 }
 0x128   : > { %839 = vmatpush1.bf16.msra.mxu0 %v838_v47  ;;  %851 = vmatpush3.bf16.msra.mxu1 %v850_v48 }
 0x129   : > { %543 = vmatprep.subr.mxu0 %v481_v49  ;;  %819 = vmatprep.subr.mxu1 %v992_v32 }
 0x12a   : > { %v478_v50 = vpop.permute.xlu1 %477 }
 0x12b   : > { %v482_v53 = vsel %vm479_vm8, %v476_v46, %v478_v50 }
 0x12c   : > { %544 = vmatpush1.msra.mxu0 %v480_v52  ;;  %820 = vmatpush3.msra.mxu1 %v482_v53 }
 0x12d   : > { %787 = vmatmul.mubr.msk.f32.vlgmr.msra.gmra.mrb[0].mxu0 %vm523_vm9, %v489_v51  ;;  %822 = vmatmul.mubr.msk.f32.vlgmr.msra.gmra.mrb[0].mxu1 %vm523_vm9, %v489_v51 }
 0x133   : > { %v521_v54 = vpop.permute.xlu0 %520 }
 0x200   : > { %v593_v55 = vpop.f32.mrb[0].mxu0  ;;  %v664_v56 = vpop.f32.mrb[0].mxu1 }
 0x201   : > { %v594_v57 = vadd.f32 %v593_v55, %v521_v54  ;;  %v665_v58 = vadd.f32 %v664_v56, %v521_v54  ;;  %v595_v59 = vpop.f32.mrb[1].mxu0  ;;  %v823_v32 = vpop.f32.mrb[1].mxu1 }
 0x202   : > { %v596_v60 = vadd.f32 %v595_v59, %v521_v54 }
 0x203   : > { %vm668_vm10 = vcmp.ge.f32.partialorder %v594_v57, 0.0  ;;  %v671_v61 = vmul.f32 0.01, %v594_v57  ;;  %vm670_vm11 = vcmp.ge.f32.partialorder %v665_v58, 0.0  ;;  %v673_v62 = vmul.f32 0.01, %v665_v58 }
 0x204   : > { %vm669_vm12 = vcmp.ge.f32.partialorder %v596_v60, 0.0  ;;  %v672_v63 = vmul.f32 0.01, %v596_v60 }
 0x205   : > { %v674_v0 = vsel %vm668_vm10, %v594_v57, %v671_v61  ;;  %v676_v1 = vsel %vm670_vm11, %v665_v58, %v673_v62 }
 0x206   : > { %677 = vst [vmem:[%s293_s7] sm:$0xff] %v674_v0  ;;  %679 = vst [vmem:[%s293_s7 + $0x10] sm:$0xff] %v676_v1  ;;  %v675_v2 = vsel %vm669_vm12, %v596_v60, %v672_v63 }
 0x207   : > { %678 = vst [vmem:[%s293_s7 + $0x8] sm:$0xff] %v675_v2 }
 0x208 PF: > { %s16_s23 = sadd.s32 1, %s982_s23   ;;  %s1120_s21 = smov %s978_s22 }
 0x209   : > { %p13_p5 = scmp.ge.s32.totalorder %s16_s23, 4   ;;  %s1121_s22 = smov %s1123_s24 }
 0x20b   :  { %15 = sbr.rel (!%p13_p5) target bundleno = 2 (0x2), region = 79 }

</bundles_post_ra>
